<compile_context>
chip_gen: v7x
topology: tpu7x:2x2x1
jax: 0.10.0
libtpu: 0.0.40
codegen_flags: <defaults>
</compile_context>

<pallas_src>
import functools

import jax
import jax.numpy as jnp
from jax.experimental import pallas as pl
from jax.experimental.pallas import tpu as pltpu


def _round_up(n, m):
    return ((n + m - 1) // m) * m


def mlp_kernel(x_ref, w1_ref, b1_ref, w2_ref, b2_ref, w3_ref, b3_ref, o_ref, *, cb):
    """One batch tile: x_ref (6, tb) bf16 -> o_ref (1, tb) f32.

    The tile is processed in cb-lane sub-chunks so the (120, cb) / (30, cb)
    activations stay vreg-resident (no f32 activation spill to VMEM).
    """
    tb = x_ref.shape[1]
    n_chunks = tb // cb
    b3 = b3_ref[0]  # scalar bias from SMEM

    # Static (fully unrolled) chunk loop == lax.fori_loop(..., unroll=True),
    # but every pl.ds start is a compile-time multiple of cb (>=128), avoiding
    # dynamic-lane-slice constraints. Iterations are independent, so there is
    # no live-range growth across the unrolled copies.
    for c in range(n_chunks):
        sl = pl.ds(c * cb, cb)            # static, 128-aligned lane window
        xc = x_ref[:, sl]                 # (6, cb) bf16, batch on lanes

        # fc1: (120,6)bf16 @ (6,cb)bf16 -> f32 acc; bias + ReLU in f32 (v5e-safe).
        h1 = jnp.dot(w1_ref[...], xc, preferred_element_type=jnp.float32)
        h1 = jnp.maximum(h1 + b1_ref[...], 0.0)

        # fc2: (30,120)bf16 @ (120,cb)bf16 -> f32 acc; bias + ReLU in f32.
        h2 = jnp.dot(w2_ref[...], h1.astype(jnp.bfloat16),
                     preferred_element_type=jnp.float32)
        h2 = jnp.maximum(h2 + b2_ref[...], 0.0)

        # fc3: avoid the degenerate N=1 MXU pass; VPU multiply + sublane reduce.
        out_c = jnp.sum(h2 * w3_ref[...], axis=0, keepdims=True) + b3  # (1, cb)
        o_ref[:, sl] = out_c.astype(o_ref.dtype)   # lane-dense, unmasked store


def net_forward(x, params, *, tb=None, cb=128):
    """x: (B, 6) float32 (PyTorch layout). Returns (B, 1) float32."""
    w1, b1, w2, b2, w3, b3 = params
    B = x.shape[0]

    # ---- batch-tile selection (perf review: big tiles, 256-aligned, >=2 steps) ----
    align = 256                     # fills the 256-wide MXU N axis on v6e/v7x
    if tb is None:
        target = 4096               # sweepable 2048..8192; amortizes ~0.35us/step
        half = _round_up((B + 1) // 2, align)
        tb = min(target, max(align, half))   # keep >=2 grid steps when B allows
    tb = max(align, _round_up(tb, align))
    cb = min(cb, tb)
    assert tb % cb == 0
    Bp = _round_up(B, tb)
    grid = (Bp // tb,)

    # Single fused pad + transpose + bf16-cast pre-pass (one XLA op).
    xT = jnp.pad(x, ((0, Bp - B), (0, 0))).T.astype(jnp.bfloat16)   # (6, Bp)

    resident = lambda a: pl.BlockSpec(a.shape, lambda i: (0, 0))
    kernel = functools.partial(mlp_kernel, cb=cb)

    out_t = pl.pallas_call(
        kernel,
        out_shape=jax.ShapeDtypeStruct((1, Bp), jnp.float32),
        grid=grid,
        in_specs=[
            pl.BlockSpec((6, tb), lambda i: (0, i)),   # x: pipelined batch tiles
            resident(w1),                               # weights/biases resident
            resident(b1),
            resident(w2),
            resident(b2),
            resident(w3),
            pl.BlockSpec(memory_space=pltpu.MemorySpace.SMEM),  # b3 scalar
        ],
        out_specs=pl.BlockSpec((1, tb), lambda i: (0, i)),      # lane-dense out
        compiler_params=pltpu.CompilerParams(
            dimension_semantics=("parallel",),          # megacore sharding on v7x
            vmem_limit_bytes=32 * 1024 * 1024,          # per-step use is ~0.5 MB
        ),
    )(xT, w1, b1, w2, b2, w3, b3)

    # Back to PyTorch layout (pure layout plumbing in the wrapper).
    return out_t[:, :B].T                               # (B, 1)


def init_params(key):
    # Mimic PyTorch nn.Linear default init: U(+/- 1/sqrt(fan_in)).
    # Stored in kernel layout: W as (out, in), bias as (out, 1).
    def linear(key, fan_in, fan_out, w_dtype):
        kw, kb = jax.random.split(key)
        bound = 1.0 / jnp.sqrt(fan_in)
        w = jax.random.uniform(kw, (fan_out, fan_in), jnp.float32, -bound, bound)
        b = jax.random.uniform(kb, (fan_out, 1), jnp.float32, -bound, bound)
        return w.astype(w_dtype), b

    k1, k2, k3 = jax.random.split(key, 3)
    w1, b1 = linear(k1, 6, 120, jnp.bfloat16)
    w2, b2 = linear(k2, 120, 30, jnp.bfloat16)
    w3, b3c = linear(k3, 30, 1, jnp.float32)
    w3 = w3.reshape(30, 1)        # column vector for the VPU-reduce fc3
    b3 = b3c.reshape(1)           # scalar, lives in SMEM
    return (w1, b1, w2, b2, w3, b3)


def reference_forward(x, params):
    # Plain-JAX reference with the same mixed-precision policy as the kernel.
    # (Does not validate f32-PyTorch parity; bf16 x/w1/w2 policy is intentional.)
    w1, b1, w2, b2, w3, b3 = params
    xT = x.T.astype(jnp.bfloat16)
    h1 = jnp.maximum(
        jnp.dot(w1, xT, preferred_element_type=jnp.float32) + b1, 0.0)
    h2 = jnp.maximum(
        jnp.dot(w2, h1.astype(jnp.bfloat16),
                preferred_element_type=jnp.float32) + b2, 0.0)
    out = jnp.sum(h2 * w3, axis=0, keepdims=True) + b3[0]
    return out.T


if __name__ == "__main__":
    key = jax.random.PRNGKey(0)
    kx, kp = jax.random.split(key)

    # batch=1000: non-multiple of the tile -> exercises padding, a 2-step grid
    # (tb=512) and the in-kernel 128-lane chunk loop (4 chunks per step).
    batch = 1000
    x = jax.random.normal(kx, (batch, 6), jnp.float32)
    params = init_params(kp)

    out = net_forward(x, params)
    jax.block_until_ready(out)

    ref = reference_forward(x, params)
    assert out.shape == (batch, 1)
    assert jnp.allclose(out, ref, atol=1e-3, rtol=1e-3), float(
        jnp.max(jnp.abs(out - ref)))

    print("KERNEL_OK")
</pallas_src>

<mosaic_0001>
module attributes {stable_mosaic.version = 11 : i64} {
  func.func @mlp_kernel(%arg0: i32, %arg1: memref<6x512xbf16, #tpu.memory_space<vmem>>, %arg2: memref<120x6xbf16, #tpu.memory_space<vmem>>, %arg3: memref<120x1xf32, #tpu.memory_space<vmem>>, %arg4: memref<30x120xbf16, #tpu.memory_space<vmem>>, %arg5: memref<30x1xf32, #tpu.memory_space<vmem>>, %arg6: memref<30x1xf32, #tpu.memory_space<vmem>>, %arg7: memref<1xf32, #tpu.memory_space<smem>>, %arg8: memref<1x512xf32, #tpu.memory_space<vmem>>) attributes {dimension_semantics = [#tpu.dimension_semantics<parallel>], iteration_bounds = array<i64: 2>, scalar_prefetch = 0 : i64, scratch_operands = 0 : i64, tpu.core_type = #tpu.core_type<tc>, window_params = [{transform_indices = @transform_0, window_bounds = array<i64: 6, 512>}, {pipeline_mode = #tpu.pipeline_mode<synchronous>, transform_indices = @transform_1, window_bounds = array<i64: 120, 6>}, {pipeline_mode = #tpu.pipeline_mode<synchronous>, transform_indices = @transform_2, window_bounds = array<i64: 120, 1>}, {pipeline_mode = #tpu.pipeline_mode<synchronous>, transform_indices = @transform_3, window_bounds = array<i64: 30, 120>}, {pipeline_mode = #tpu.pipeline_mode<synchronous>, transform_indices = @transform_4, window_bounds = array<i64: 30, 1>}, {pipeline_mode = #tpu.pipeline_mode<synchronous>, transform_indices = @transform_5, window_bounds = array<i64: 30, 1>}, {transform_indices = @transform_6, window_bounds = array<i64: 1>}, {transform_indices = @transform_7, window_bounds = array<i64: 1, 512>}]} {
    %c0 = arith.constant 0 : index
    %0 = memref.load %arg7[%c0] : memref<1xf32, #tpu.memory_space<smem>>
    %c0_0 = arith.constant 0 : index
    %c0_1 = arith.constant 0 : index
    %1 = vector.load %arg1[%c0_0, %c0_1] : memref<6x512xbf16, #tpu.memory_space<vmem>>, vector<6x128xbf16>
    %c0_2 = arith.constant 0 : index
    %c0_3 = arith.constant 0 : index
    %2 = vector.load %arg2[%c0_2, %c0_3] : memref<120x6xbf16, #tpu.memory_space<vmem>>, vector<120x6xbf16>
    %cst = arith.constant dense<0.000000e+00> : vector<120x128xf32>
    %3 = tpu.matmul %2, %1, %cst {dimension_numbers = #tpu.dot_dimension_numbers<[1], [0], [0], [1], [0, 0, 1, 1], [], []>} : vector<120x6xbf16>, vector<6x128xbf16>, vector<120x128xf32> -> vector<120x128xf32>
    %c0_4 = arith.constant 0 : index
    %c0_5 = arith.constant 0 : index
    %4 = vector.load %arg3[%c0_4, %c0_5] : memref<120x1xf32, #tpu.memory_space<vmem>>, vector<120x1xf32>
    %5 = vector.broadcast %4 : vector<120x1xf32> to vector<120x128xf32>
    %6 = arith.addf %3, %5 : vector<120x128xf32>
    %cst_6 = arith.constant 0.000000e+00 : f32
    %7 = vector.broadcast %cst_6 : f32 to vector<120x128xf32>
    %8 = arith.maximumf %6, %7 : vector<120x128xf32>
    %c0_7 = arith.constant 0 : index
    %c0_8 = arith.constant 0 : index
    %9 = vector.load %arg4[%c0_7, %c0_8] : memref<30x120xbf16, #tpu.memory_space<vmem>>, vector<30x120xbf16>
    %10 = arith.truncf %8 : vector<120x128xf32> to vector<120x128xbf16>
    %cst_9 = arith.constant dense<0.000000e+00> : vector<30x128xf32>
    %11 = tpu.matmul %9, %10, %cst_9 {dimension_numbers = #tpu.dot_dimension_numbers<[1], [0], [0], [1], [0, 0, 1, 1], [], []>} : vector<30x120xbf16>, vector<120x128xbf16>, vector<30x128xf32> -> vector<30x128xf32>
    %c0_10 = arith.constant 0 : index
    %c0_11 = arith.constant 0 : index
    %12 = vector.load %arg5[%c0_10, %c0_11] : memref<30x1xf32, #tpu.memory_space<vmem>>, vector<30x1xf32>
    %13 = vector.broadcast %12 : vector<30x1xf32> to vector<30x128xf32>
    %14 = arith.addf %11, %13 : vector<30x128xf32>
    %cst_12 = arith.constant 0.000000e+00 : f32
    %15 = vector.broadcast %cst_12 : f32 to vector<30x128xf32>
    %16 = arith.maximumf %14, %15 : vector<30x128xf32>
    %c0_13 = arith.constant 0 : index
    %c0_14 = arith.constant 0 : index
    %17 = vector.load %arg6[%c0_13, %c0_14] : memref<30x1xf32, #tpu.memory_space<vmem>>, vector<30x1xf32>
    %18 = vector.broadcast %17 : vector<30x1xf32> to vector<30x128xf32>
    %19 = arith.mulf %16, %18 : vector<30x128xf32>
    %cst_15 = arith.constant dense<0.000000e+00> : vector<128xf32>
    %20 = vector.multi_reduction <add>, %19, %cst_15 [0] : vector<30x128xf32> to vector<128xf32>
    %21 = vector.shape_cast %20 : vector<128xf32> to vector<1x128xf32>
    %22 = vector.broadcast %0 : f32 to vector<1x128xf32>
    %23 = arith.addf %21, %22 : vector<1x128xf32>
    %c0_16 = arith.constant 0 : index
    %c0_17 = arith.constant 0 : index
    %24 = vector.load %arg8[%c0_16, %c0_17] : memref<1x512xf32, #tpu.memory_space<vmem>>, vector<1x128xf32>
    tpu.vector_store %arg8[%c0_16, %c0_17], %23 {strides = array<i32>} : memref<1x512xf32, #tpu.memory_space<vmem>>, vector<1x128xf32>,
    %c0_18 = arith.constant 0 : index
    %c128 = arith.constant 128 : index
    %25 = vector.load %arg1[%c0_18, %c128] : memref<6x512xbf16, #tpu.memory_space<vmem>>, vector<6x128xbf16>
    %c0_19 = arith.constant 0 : index
    %c0_20 = arith.constant 0 : index
    %26 = vector.load %arg2[%c0_19, %c0_20] : memref<120x6xbf16, #tpu.memory_space<vmem>>, vector<120x6xbf16>
    %cst_21 = arith.constant dense<0.000000e+00> : vector<120x128xf32>
    %27 = tpu.matmul %26, %25, %cst_21 {dimension_numbers = #tpu.dot_dimension_numbers<[1], [0], [0], [1], [0, 0, 1, 1], [], []>} : vector<120x6xbf16>, vector<6x128xbf16>, vector<120x128xf32> -> vector<120x128xf32>
    %c0_22 = arith.constant 0 : index
    %c0_23 = arith.constant 0 : index
    %28 = vector.load %arg3[%c0_22, %c0_23] : memref<120x1xf32, #tpu.memory_space<vmem>>, vector<120x1xf32>
    %29 = vector.broadcast %28 : vector<120x1xf32> to vector<120x128xf32>
    %30 = arith.addf %27, %29 : vector<120x128xf32>
    %cst_24 = arith.constant 0.000000e+00 : f32
    %31 = vector.broadcast %cst_24 : f32 to vector<120x128xf32>
    %32 = arith.maximumf %30, %31 : vector<120x128xf32>
    %c0_25 = arith.constant 0 : index
    %c0_26 = arith.constant 0 : index
    %33 = vector.load %arg4[%c0_25, %c0_26] : memref<30x120xbf16, #tpu.memory_space<vmem>>, vector<30x120xbf16>
    %34 = arith.truncf %32 : vector<120x128xf32> to vector<120x128xbf16>
    %cst_27 = arith.constant dense<0.000000e+00> : vector<30x128xf32>
    %35 = tpu.matmul %33, %34, %cst_27 {dimension_numbers = #tpu.dot_dimension_numbers<[1], [0], [0], [1], [0, 0, 1, 1], [], []>} : vector<30x120xbf16>, vector<120x128xbf16>, vector<30x128xf32> -> vector<30x128xf32>
    %c0_28 = arith.constant 0 : index
    %c0_29 = arith.constant 0 : index
    %36 = vector.load %arg5[%c0_28, %c0_29] : memref<30x1xf32, #tpu.memory_space<vmem>>, vector<30x1xf32>
    %37 = vector.broadcast %36 : vector<30x1xf32> to vector<30x128xf32>
    %38 = arith.addf %35, %37 : vector<30x128xf32>
    %cst_30 = arith.constant 0.000000e+00 : f32
    %39 = vector.broadcast %cst_30 : f32 to vector<30x128xf32>
    %40 = arith.maximumf %38, %39 : vector<30x128xf32>
    %c0_31 = arith.constant 0 : index
    %c0_32 = arith.constant 0 : index
    %41 = vector.load %arg6[%c0_31, %c0_32] : memref<30x1xf32, #tpu.memory_space<vmem>>, vector<30x1xf32>
    %42 = vector.broadcast %41 : vector<30x1xf32> to vector<30x128xf32>
    %43 = arith.mulf %40, %42 : vector<30x128xf32>
    %cst_33 = arith.constant dense<0.000000e+00> : vector<128xf32>
    %44 = vector.multi_reduction <add>, %43, %cst_33 [0] : vector<30x128xf32> to vector<128xf32>
    %45 = vector.shape_cast %44 : vector<128xf32> to vector<1x128xf32>
    %46 = vector.broadcast %0 : f32 to vector<1x128xf32>
    %47 = arith.addf %45, %46 : vector<1x128xf32>
    %c0_34 = arith.constant 0 : index
    %c128_35 = arith.constant 128 : index
    %48 = vector.load %arg8[%c0_34, %c128_35] : memref<1x512xf32, #tpu.memory_space<vmem>>, vector<1x128xf32>
    tpu.vector_store %arg8[%c0_34, %c128_35], %47 {strides = array<i32>} : memref<1x512xf32, #tpu.memory_space<vmem>>, vector<1x128xf32>,
    %c0_36 = arith.constant 0 : index
    %c256 = arith.constant 256 : index
    %49 = vector.load %arg1[%c0_36, %c256] : memref<6x512xbf16, #tpu.memory_space<vmem>>, vector<6x128xbf16>
    %c0_37 = arith.constant 0 : index
    %c0_38 = arith.constant 0 : index
    %50 = vector.load %arg2[%c0_37, %c0_38] : memref<120x6xbf16, #tpu.memory_space<vmem>>, vector<120x6xbf16>
    %cst_39 = arith.constant dense<0.000000e+00> : vector<120x128xf32>
    %51 = tpu.matmul %50, %49, %cst_39 {dimension_numbers = #tpu.dot_dimension_numbers<[1], [0], [0], [1], [0, 0, 1, 1], [], []>} : vector<120x6xbf16>, vector<6x128xbf16>, vector<120x128xf32> -> vector<120x128xf32>
    %c0_40 = arith.constant 0 : index
    %c0_41 = arith.constant 0 : index
    %52 = vector.load %arg3[%c0_40, %c0_41] : memref<120x1xf32, #tpu.memory_space<vmem>>, vector<120x1xf32>
    %53 = vector.broadcast %52 : vector<120x1xf32> to vector<120x128xf32>
    %54 = arith.addf %51, %53 : vector<120x128xf32>
    %cst_42 = arith.constant 0.000000e+00 : f32
    %55 = vector.broadcast %cst_42 : f32 to vector<120x128xf32>
    %56 = arith.maximumf %54, %55 : vector<120x128xf32>
    %c0_43 = arith.constant 0 : index
    %c0_44 = arith.constant 0 : index
    %57 = vector.load %arg4[%c0_43, %c0_44] : memref<30x120xbf16, #tpu.memory_space<vmem>>, vector<30x120xbf16>
    %58 = arith.truncf %56 : vector<120x128xf32> to vector<120x128xbf16>
    %cst_45 = arith.constant dense<0.000000e+00> : vector<30x128xf32>
    %59 = tpu.matmul %57, %58, %cst_45 {dimension_numbers = #tpu.dot_dimension_numbers<[1], [0], [0], [1], [0, 0, 1, 1], [], []>} : vector<30x120xbf16>, vector<120x128xbf16>, vector<30x128xf32> -> vector<30x128xf32>
    %c0_46 = arith.constant 0 : index
    %c0_47 = arith.constant 0 : index
    %60 = vector.load %arg5[%c0_46, %c0_47] : memref<30x1xf32, #tpu.memory_space<vmem>>, vector<30x1xf32>
    %61 = vector.broadcast %60 : vector<30x1xf32> to vector<30x128xf32>
    %62 = arith.addf %59, %61 : vector<30x128xf32>
    %cst_48 = arith.constant 0.000000e+00 : f32
    %63 = vector.broadcast %cst_48 : f32 to vector<30x128xf32>
    %64 = arith.maximumf %62, %63 : vector<30x128xf32>
    %c0_49 = arith.constant 0 : index
    %c0_50 = arith.constant 0 : index
    %65 = vector.load %arg6[%c0_49, %c0_50] : memref<30x1xf32, #tpu.memory_space<vmem>>, vector<30x1xf32>
    %66 = vector.broadcast %65 : vector<30x1xf32> to vector<30x128xf32>
    %67 = arith.mulf %64, %66 : vector<30x128xf32>
    %cst_51 = arith.constant dense<0.000000e+00> : vector<128xf32>
    %68 = vector.multi_reduction <add>, %67, %cst_51 [0] : vector<30x128xf32> to vector<128xf32>
    %69 = vector.shape_cast %68 : vector<128xf32> to vector<1x128xf32>
    %70 = vector.broadcast %0 : f32 to vector<1x128xf32>
    %71 = arith.addf %69, %70 : vector<1x128xf32>
    %c0_52 = arith.constant 0 : index
    %c256_53 = arith.constant 256 : index
    %72 = vector.load %arg8[%c0_52, %c256_53] : memref<1x512xf32, #tpu.memory_space<vmem>>, vector<1x128xf32>
    tpu.vector_store %arg8[%c0_52, %c256_53], %71 {strides = array<i32>} : memref<1x512xf32, #tpu.memory_space<vmem>>, vector<1x128xf32>,
    %c0_54 = arith.constant 0 : index
    %c384 = arith.constant 384 : index
    %73 = vector.load %arg1[%c0_54, %c384] : memref<6x512xbf16, #tpu.memory_space<vmem>>, vector<6x128xbf16>
    %c0_55 = arith.constant 0 : index
    %c0_56 = arith.constant 0 : index
    %74 = vector.load %arg2[%c0_55, %c0_56] : memref<120x6xbf16, #tpu.memory_space<vmem>>, vector<120x6xbf16>
    %cst_57 = arith.constant dense<0.000000e+00> : vector<120x128xf32>
    %75 = tpu.matmul %74, %73, %cst_57 {dimension_numbers = #tpu.dot_dimension_numbers<[1], [0], [0], [1], [0, 0, 1, 1], [], []>} : vector<120x6xbf16>, vector<6x128xbf16>, vector<120x128xf32> -> vector<120x128xf32>
    %c0_58 = arith.constant 0 : index
    %c0_59 = arith.constant 0 : index
    %76 = vector.load %arg3[%c0_58, %c0_59] : memref<120x1xf32, #tpu.memory_space<vmem>>, vector<120x1xf32>
    %77 = vector.broadcast %76 : vector<120x1xf32> to vector<120x128xf32>
    %78 = arith.addf %75, %77 : vector<120x128xf32>
    %cst_60 = arith.constant 0.000000e+00 : f32
    %79 = vector.broadcast %cst_60 : f32 to vector<120x128xf32>
    %80 = arith.maximumf %78, %79 : vector<120x128xf32>
    %c0_61 = arith.constant 0 : index
    %c0_62 = arith.constant 0 : index
    %81 = vector.load %arg4[%c0_61, %c0_62] : memref<30x120xbf16, #tpu.memory_space<vmem>>, vector<30x120xbf16>
    %82 = arith.truncf %80 : vector<120x128xf32> to vector<120x128xbf16>
    %cst_63 = arith.constant dense<0.000000e+00> : vector<30x128xf32>
    %83 = tpu.matmul %81, %82, %cst_63 {dimension_numbers = #tpu.dot_dimension_numbers<[1], [0], [0], [1], [0, 0, 1, 1], [], []>} : vector<30x120xbf16>, vector<120x128xbf16>, vector<30x128xf32> -> vector<30x128xf32>
    %c0_64 = arith.constant 0 : index
    %c0_65 = arith.constant 0 : index
    %84 = vector.load %arg5[%c0_64, %c0_65] : memref<30x1xf32, #tpu.memory_space<vmem>>, vector<30x1xf32>
    %85 = vector.broadcast %84 : vector<30x1xf32> to vector<30x128xf32>
    %86 = arith.addf %83, %85 : vector<30x128xf32>
    %cst_66 = arith.constant 0.000000e+00 : f32
    %87 = vector.broadcast %cst_66 : f32 to vector<30x128xf32>
    %88 = arith.maximumf %86, %87 : vector<30x128xf32>
    %c0_67 = arith.constant 0 : index
    %c0_68 = arith.constant 0 : index
    %89 = vector.load %arg6[%c0_67, %c0_68] : memref<30x1xf32, #tpu.memory_space<vmem>>, vector<30x1xf32>
    %90 = vector.broadcast %89 : vector<30x1xf32> to vector<30x128xf32>
    %91 = arith.mulf %88, %90 : vector<30x128xf32>
    %cst_69 = arith.constant dense<0.000000e+00> : vector<128xf32>
    %92 = vector.multi_reduction <add>, %91, %cst_69 [0] : vector<30x128xf32> to vector<128xf32>
    %93 = vector.shape_cast %92 : vector<128xf32> to vector<1x128xf32>
    %94 = vector.broadcast %0 : f32 to vector<1x128xf32>
    %95 = arith.addf %93, %94 : vector<1x128xf32>
    %c0_70 = arith.constant 0 : index
    %c384_71 = arith.constant 384 : index
    %96 = vector.load %arg8[%c0_70, %c384_71] : memref<1x512xf32, #tpu.memory_space<vmem>>, vector<1x128xf32>
    tpu.vector_store %arg8[%c0_70, %c384_71], %95 {strides = array<i32>} : memref<1x512xf32, #tpu.memory_space<vmem>>, vector<1x128xf32>,
    return
  }
  func.func @transform_0(%arg0: i32) -> (i32, i32) {
    %c0_i32 = arith.constant 0 : i32
    %c0_i32_0 = arith.constant 0 : i32
    return %c0_i32, %arg0 : i32, i32
  }
  func.func @transform_1(%arg0: i32) -> (i32, i32) {
    %c0_i32 = arith.constant 0 : i32
    %c0_i32_0 = arith.constant 0 : i32
    %c0_i32_1 = arith.constant 0 : i32
    return %c0_i32, %c0_i32_0 : i32, i32
  }
  func.func @transform_2(%arg0: i32) -> (i32, i32) {
    %c0_i32 = arith.constant 0 : i32
    %c0_i32_0 = arith.constant 0 : i32
    %c0_i32_1 = arith.constant 0 : i32
    return %c0_i32, %c0_i32_0 : i32, i32
  }
  func.func @transform_3(%arg0: i32) -> (i32, i32) {
    %c0_i32 = arith.constant 0 : i32
    %c0_i32_0 = arith.constant 0 : i32
    %c0_i32_1 = arith.constant 0 : i32
    return %c0_i32, %c0_i32_0 : i32, i32
  }
  func.func @transform_4(%arg0: i32) -> (i32, i32) {
    %c0_i32 = arith.constant 0 : i32
    %c0_i32_0 = arith.constant 0 : i32
    %c0_i32_1 = arith.constant 0 : i32
    return %c0_i32, %c0_i32_0 : i32, i32
  }
  func.func @transform_5(%arg0: i32) -> (i32, i32) {
    %c0_i32 = arith.constant 0 : i32
    %c0_i32_0 = arith.constant 0 : i32
    %c0_i32_1 = arith.constant 0 : i32
    return %c0_i32, %c0_i32_0 : i32, i32
  }
  func.func @transform_6(%arg0: i32) -> i32 {
    %c0_i32 = arith.constant 0 : i32
    %c0_i32_0 = arith.constant 0 : i32
    return %c0_i32 : i32
  }
  func.func @transform_7(%arg0: i32) -> (i32, i32) {
    %c0_i32 = arith.constant 0 : i32
    %c0_i32_0 = arith.constant 0 : i32
    return %c0_i32, %arg0 : i32, i32
  }
}

</mosaic_0001>

<bundles_post_ra>
// kernel: tpu_custom_call.1
= control target key start
LH: loop header
LB: loop body
LE: loop exit
PB: predicated region body
PF: predicated region fallthrough
CT: control target
= control target key end

     0   :  { %s3197_s0 = inlined_call_operand.vmem [shape: bf16[6,1024], index: 0, kind: input, shape index: {}]   ;;  %s3198_s1 = inlined_call_operand.vmem [shape: bf16[120,6], index: 1, kind: input, shape index: {}]   ;;  %s3199_s2 = inlined_call_operand.vmem [shape: f32[120,1], index: 2, kind: input, shape index: {}]   ;;  %s3200_s3 = inlined_call_operand.vmem [shape: bf16[30,120], index: 3, kind: input, shape index: {}]   ;;  %s3201_s4 = inlined_call_operand.vmem [shape: f32[30,1], index: 4, kind: input, shape index: {}]   ;;  %s3202_s5 = inlined_call_operand.vmem [shape: f32[30,1], index: 5, kind: input, shape index: {}]   ;;  %s3203_s6 = inlined_call_operand.<no memory space> [shape: f32[1], index: 6, kind: input, shape index: {}]   ;;  %s3204_s7 = inlined_call_operand.hbm [shape: f32[1,1024], index: 7, kind: output, shape index: {}]  }
   0x1   :  { %12 = sst [smem:[#allocation2]] %s3203_s6 }
   0x2   :  { %13 = vsyncpa [#allocation4], 0 }
   0x3   :  { %15 = vsyncpa [#allocation4 + $0x1], 0  ;;  %s2607_s26 = smov 0   ;;  %s2609_s27 = smov 0  }
   0x4   :  { %s2611_s28 = smov 0   ;;  %s2613_s29 = smov 0  }
   0x5 LB: > { %s2628_s6 = sadd.s32 4294967295, %s2560_s29   ;;  %s2087_s30 = sadd.s32 4294967294, %s2560_s29   ;;  %s2560_s29 = sphi %s2613_s29, %s3212_s29   ;;  %s2556_s28 = sphi %s2611_s28, %s3211_s28   ;;  %s2552_s27 = sphi %s2609_s27, %s3210_s27   ;;  %s2548_s26 = sphi %s2607_s26, %s3209_s26  }
   0x6   : > { %s2632_s8 = sadd.s32 1, %s2560_s29   ;;  %s180_s9 = sadd.s32 1, %s2556_s28 }
   0x7   : > { %s177_s10 = ssub.s32 %s2560_s29, %s2632_s8  ;;  %p190_p0 = scmp.ne.s32.totalorder %s2556_s28, %s2552_s27 }
   0x8   : > { %p178_p1 = scmp.eq.s32.totalorder %s177_s10, 0  ;;  %p191_p2 = scmp.eq.s32.totalorder %s2628_s6, 1 }
   0x9   : > { %p196_p3 = scmp.ne.s32.totalorder %s2552_s27, %s2548_s26  ;;  %p197_p4 = scmp.eq.s32.totalorder %s2087_s30, 1 }
   0xa   : > { %s2643_s11 = scalar_select %p178_p1, %s2556_s28, %s180_s9  }
   0xb   : > { %p2645_p5 = por %p191_p2, %p190_p0  ;;  %p2649_p6 = por %p197_p4, %p196_p3 }
   0xc   : > { %p2090_p7 = scmp.ge.s32.totalorder %s2560_s29, 1  ;;  %p242_p8 = scmp.lt.s32.totalorder %s2560_s29, 3 }
   0xe   : > { %p243_p9 = pnand %p2090_p7, %p242_p8 }
   0xf   : > { %v2658_v0 = vld [vmem:[%s3199_s2 + $0x10] sm:$0xff] (!%p243_p9)  ;;  %v2663_v1 = vld [vmem:[%s3199_s2] sm:$0xff] (!%p243_p9)  ;;  %s2092_s18 = sshll.u32 (!%p243_p9), %s2628_s6, 2  ;;  %v2562_v2 = vmov (!%p243_p9), 0   ;;  %v2669_v3 = vld [vmem:[%s3199_s2 + $0x18] sm:$0xff] (!%p243_p9)  ;;  %vm427_vm0 = vcmask (!%p243_p9), 48128  }
  0x10   : > { %246 = sbr.rel (%p243_p9) target bundleno = 635 (0x27b), region = 48  ;;  %2457 = vset.pattern.permute.xlu1 (!%p243_p9), %v2562_v2  ;;  %2456 = vset.pattern.permute.xlu0 (!%p243_p9), %v2562_v2  ;;  %p275_p10 = scmp.lt.s32.totalorder (!%p243_p9), %s2092_s18, 7  ;;  %v2458_v4 = vld [vmem:[%s3198_s1] sm:$0xff] (!%p243_p9)   ;;  %v2679_v5 = vld [vmem:[%s3199_s2 + $0x8] sm:$0xff] (!%p243_p9)  ;;  %vm452_vm1 = vcmask (!%p243_p9), 1042432   ;;  %v2460_v12 = vld [vmem:[%s3198_s1 + $0x10] sm:$0xff] (!%p243_p9)  }
  0x11   : > { %326 = vperm.xlu1 (!%p243_p9), %2457, %v2658_v0   ;;  %316 = vperm.xlu0 (!%p243_p9), %2456, %v2663_v1   ;;  %v2692_v6 = vld [vmem:[%s3199_s2 + $0x28] sm:$0xff] (!%p243_p9)  ;;  %v2698_v8 = vld [vmem:[%s3199_s2 + $0x20] sm:$0xff] (!%p243_p9)  ;;  %v2716_v14 = vld [vmem:[%s3199_s2 + $0x38] sm:$0xff] (!%p243_p9)  ;;  %vm613_vm2 = vcmask (!%p243_p9), 982016   ;;  %vm620_vm3 = vcmask (!%p243_p9), 1043456   ;;  %vm707_vm4 = vcmask (!%p243_p9), 1045504  }
  0x12   : > { %2258 = vmatprep.mubr.msk.bf16.mxu0 (!%p243_p9), %vm427_vm0, %v2458_v4  ;;  %v2459_v11 = vld [vmem:[%s3198_s1 + $0x8] sm:$0xff] (!%p243_p9)   ;;  %v2721_v15 = vld [vmem:[%s3199_s2 + $0x30] sm:$0xff] (!%p243_p9)  ;;  %v2735_v17 = vld [vmem:[%s3199_s2 + $0x40] sm:$0xff] (!%p243_p9)  ;;  %s282_s24 = sld [smem:[#allocation2]] (!%p243_p9)  ;;  %s2179_s14 = sshll.u32 (!%p243_p9), %s2628_s6, 6 }
  0x13   : > { %v2730_v16 = vld [vmem:[%s3199_s2 + $0x48] sm:$0xff] (!%p243_p9)  ;;  %v2461_v19 = vld [vmem:[%s3198_s1 + $0x18] sm:$0xff] (!%p243_p9)   ;;  %v2462_v20 = vld [vmem:[%s3198_s1 + $0x20] sm:$0xff] (!%p243_p9)   ;;  %s2563_s19 = smov (!%p243_p9), [#allocation3]  }
  0x14   : > { %v2750_v21 = vld [vmem:[%s3199_s2 + $0x58] sm:$0xff] (!%p243_p9)  ;;  %v2755_v22 = vld [vmem:[%s3199_s2 + $0x50] sm:$0xff] (!%p243_p9)  ;;  %v2764_v23 = vld [vmem:[%s3199_s2 + $0x68] sm:$0xff] (!%p243_p9)  ;;  %s2502_s20 = sshll.u32 (!%p243_p9), %s2563_s19, 4  ;;  %s2503_s20 = int_to_ptr.vmem [resolvable:$false] %s2502_s20 }
  0x15   : > { %331 = vperm.xlu1 (!%p243_p9), %2457, %v2669_v3   ;;  %321 = vperm.xlu0 (!%p243_p9), %2456, %v2679_v5   ;;  %v2769_v24 = vld [vmem:[%s3199_s2 + $0x60] sm:$0xff] (!%p243_p9)  ;;  %v2463_v25 = vld [vmem:[%s3198_s1 + $0x28] sm:$0xff] (!%p243_p9)   ;;  %v2464_v26 = vld [vmem:[%s3198_s1 + $0x30] sm:$0xff] (!%p243_p9)   ;;  %s2504_s21 = scalar_lea.vmem (!%p243_p9), %s2503_s20, 128 }
  0x16   : > { %v2782_v27 = vld [vmem:[%s3199_s2 + $0x70] sm:$0xff] (!%p243_p9)  ;;  %v2465_v28 = vld [vmem:[%s3198_s1 + $0x38] ss:$0 sps:$4 sm:$0xff] (!%p243_p9)   ;;  %v2466_v29 = vld [vmem:[%s3198_s1] sm:$0xff] (!%p243_p9)  }
  0x17   : > { %s3214_s18 = smov (!%p275_p10, %s2092_s18), 7  ;;  %v2467_v30 = vld [vmem:[%s3198_s1 + $0x8] sm:$0xff]   ;;  %v2468_v32 = vld [vmem:[%s3198_s1 + $0x10] sm:$0xff]   ;;  %v2469_v34 = vld [vmem:[%s3198_s1 + $0x18] sm:$0xff]  }
  0x18   : > { %s2093_s25 = sshll.u32 %s3214_s18, 2  ;;  %v2470_v35 = vld [vmem:[%s3198_s1 + $0x20] sm:$0xff]   ;;  %v2471_v36 = vld [vmem:[%s3198_s1 + $0x28] sm:$0xff]   ;;  %v2472_v37 = vld [vmem:[%s3198_s1 + $0x30] sm:$0xff]  }
  0x19   : > { %s2687_s10 = scalar_lea.vmem %s3197_s0, %s2093_s25  ;;  %341 = vperm.xlu1 %2457, %v2692_v6   ;;  %336 = vperm.xlu0 %2456, %v2698_v8   ;;  %v2473_v38 = vld [vmem:[%s3198_s1 + $0x38] ss:$0 sps:$4 sm:$0xff]   ;;  %v2474_v39 = vld [vmem:[%s3198_s1] sm:$0xff]   ;;  %v2475_v40 = vld [vmem:[%s3198_s1 + $0x8] sm:$0xff]   ;;  %s271_s25 = sand.u32 1, %s2552_s27  }
  0x1a   : > { %v283_v7 = vld [vmem:[%s2687_s10] sm:$0x7]  ;;  %v723_v9 = vld [vmem:[%s2687_s10 + $0x4] sm:$0x7]  ;;  %v1153_v18 = vld [vmem:[%s2687_s10 + $0x8] sm:$0x7] }
  0x1b   : > { %2408 = vmatprep.subr.msk.bf16.mxu0 %vm452_vm1, %v283_v7  ;;  %v454_v10 = vsel %vm452_vm1, %v283_v7, 0  ;;  %v892_v13 = vsel %vm452_vm1, %v723_v9, 0  ;;  %v1322_v31 = vsel %vm452_vm1, %v1153_v18, 0  ;;  %v1583_v33 = vld [vmem:[%s2687_s10 + $0xc] sm:$0x7]  ;;  %v2476_v41 = vld [vmem:[%s3198_s1 + $0x10] sm:$0xff]   ;;  %s3150_s10 = scalar_lea.hbm %s3204_s7, %s2179_s14 }
  0x1c   : > { %2257 = vmatpush3.bf16.msra.mxu0 %v454_v10  ;;  %v1752_v42 = vsel %vm452_vm1, %v1583_v33, 0  ;;  %v2477_v43 = vld [vmem:[%s3198_s1 + $0x18] sm:$0xff]   ;;  %v2478_v44 = vld [vmem:[%s3198_s1 + $0x20] sm:$0xff]   ;;  %v2479_v45 = vld [vmem:[%s3198_s1 + $0x28] sm:$0xff]   ;;  %s2091_s30 = sshll.u32 %s271_s25, 2  ;;  %s2014_s18 = scalar_lea.sflag [#allocation4], %s271_s25 }
  0x1d   : > { %2410 = vmatprep.subr.msk.bf16.mxu0 %vm452_vm1, %v723_v9  ;;  %351 = vperm.xlu1 %2457, %v2716_v14   ;;  %v2480_v46 = vld [vmem:[%s3198_s1 + $0x30] sm:$0xff]   ;;  %v2481_v47 = vld [vmem:[%s3198_s1 + $0x38] ss:$0 sps:$4 sm:$0xff]   ;;  %v2482_v48 = vld [vmem:[%s3198_s1] sm:$0xff]   ;;  %s3116_s9 = scalar_lea.vmem [#allocation3], %s2091_s30 }
  0x1e   : > { %346 = vperm.xlu0 %2456, %v2721_v15   ;;  %v2483_v49 = vld [vmem:[%s3198_s1 + $0x8] sm:$0xff]   ;;  %v2484_v50 = vld [vmem:[%s3198_s1 + $0x10] sm:$0xff]   ;;  %v2485_v51 = vld [vmem:[%s3198_s1 + $0x18] sm:$0xff]   ;;  %s2028_s15 = sshll.u32 %s3116_s9, 4  ;;  %s3152_s15 = int_to_ptr.vmem [resolvable:$true] %s2028_s15 }
  0x1f   : > { %2259 = vmatmul.mubr.msk.bf16.vlgmr.msra.gmra.mrb[0].mxu0 %vm427_vm0, %v2459_v11  ;;  %v2486_v52 = vld [vmem:[%s3198_s1 + $0x20] sm:$0xff]   ;;  %v580_v53 = vld [vmem:[%s3201_s4 + $0x8] sm:$0xff]  ;;  %v2488_v56 = vld [vmem:[%s3198_s1 + $0x30] sm:$0xff]   ;;  %s2498_s6 = scalar_lea.vmem %s3152_s15, 64  ;;  %p2505_p0 = scmp.lt.s32.totalorder %s3152_s15, %s2503_s20 }
  0x20   : > { %2295 = vmatpush3.bf16.msra.mxu0 %v892_v13  ;;  %2262 = vmatprep.mubr.msk.bf16.mxu0 %vm427_vm0, %v2460_v12  ;;  %v579_v54 = vld [vmem:[%s3201_s4] sm:$0xff]  ;;  %v2487_v55 = vld [vmem:[%s3198_s1 + $0x28] sm:$0xff]   ;;  %v582_v57 = vld [vmem:[%s3201_s4 + $0x18] sm:$0x3f]  ;;  %p2499_p11 = scmp.ne.s32.totalorder %s3152_s15, %s2498_s6  ;;  %p2506_p1 = scmp.lt.s32.totalorder %s2504_s21, %s2498_s6 }
  0x21   : > { %2412 = vmatprep.subr.msk.bf16.mxu0 %vm452_vm1, %v1153_v18  ;;  %361 = vperm.xlu1 %2457, %v2730_v16   ;;  %v581_v58 = vld [vmem:[%s3201_s4 + $0x10] sm:$0xff]  ;;  %v678_v59 = vld [vmem:[%s3202_s5 + $0x8] sm:$0xff]  ;;  %v677_v60 = vld [vmem:[%s3202_s5] sm:$0xff] }
  0x22   : > { %356 = vperm.xlu0 %2456, %v2735_v17   ;;  %v2489_v61 = vld [vmem:[%s3198_s1 + $0x38] ss:$0 sps:$4 sm:$0xff]   ;;  %v679_v63 = vld [vmem:[%s3202_s5 + $0x10] sm:$0xff]  ;;  %p2500_p12 = pnand %p2499_p11, %p2645_p5  ;;  %p2507_p2 = por %p2506_p1, %p2505_p0 }
  0x23   : > { %v680_v62 = vld [vmem:[%s3202_s5 + $0x18] sm:$0x3f] }
  0x24   : > { %v1880_v2 = vld [vmem:[%s3201_s4 + $0x18] sm:$0x3f]  ;;  %p2501_p13 = pneg %p2500_p12 }
  0x25   : > { %371 = vperm.xlu1 %2457, %v2750_v21   ;;  %v1116_v7 = vld [vmem:[%s3202_s5 + $0x18] sm:$0x3f] }
  0x26   : > { %366 = vperm.xlu0 %2456, %v2755_v22   ;;  %v1976_v9 = vld [vmem:[%s3202_s5 + $0x18] sm:$0x3f]  ;;  %p2508_p3 = pnand %p2507_p2, %p2501_p13 }
  0x27   : > { %2263 = vmatmul.mubr.msk.bf16.gmra.mrb[4].mxu0 %vm427_vm0, %v2461_v19  ;;  %v1546_v10 = vld [vmem:[%s3202_s5 + $0x18] sm:$0x3f] }
  0x28   : > { %2266 = vmatprep.mubr.msk.bf16.mxu0 %vm427_vm0, %v2462_v20 }
  0x29   : > { %381 = vperm.xlu1 %2457, %v2764_v23  }
  0x2a   : > { %376 = vperm.xlu0 %2456, %v2769_v24  }
  0x2d   : > { %756 = vperm.xlu1 %2457, %v2663_v1  }
  0x2e   : > { %386 = vperm.xlu0 %2456, %v2782_v27  }
  0x2f   : > { %2267 = vmatmul.mubr.msk.bf16.gmra.mrb[8].mxu0 %vm427_vm0, %v2463_v25 }
  0x30   : > { %2270 = vmatprep.mubr.msk.bf16.mxu0 %vm427_vm0, %v2464_v26 }
  0x31   : > { %766 = vperm.xlu1 %2457, %v2658_v0  }
  0x32   : > { %761 = vperm.xlu0 %2456, %v2679_v5  }
  0x35   : > { %776 = vperm.xlu1 %2457, %v2698_v8  }
  0x36   : > { %771 = vperm.xlu0 %2456, %v2669_v3  }
  0x37   : > { %2271 = vmatmul.mubr.msk.bf16.gmra.mrb[12].mxu0 %vm427_vm0, %v2465_v28 }
  0x38   : > { %2296 = vmatprep.mubr.msk.bf16.mxu0 %vm427_vm0, %v2466_v29 }
  0x39   : > { %786 = vperm.xlu1 %2457, %v2721_v15  }
  0x3a   : > { %781 = vperm.xlu0 %2456, %v2692_v6  }
  0x3d   : > { %796 = vperm.xlu1 %2457, %v2735_v17  }
  0x3e   : > { %791 = vperm.xlu0 %2456, %v2716_v14  }
  0x3f   : > { %2297 = vmatmul.mubr.msk.bf16.vlgmr.msra.gmra.mrb[16].mxu0 %vm427_vm0, %v2467_v30 }
  0x40   : > { %2333 = vmatpush3.bf16.msra.mxu0 %v1322_v31  ;;  %2300 = vmatprep.mubr.msk.bf16.mxu0 %vm427_vm0, %v2468_v32 }
  0x41   : > { %2414 = vmatprep.subr.msk.bf16.mxu0 %vm452_vm1, %v1583_v33  ;;  %806 = vperm.xlu1 %2457, %v2755_v22  }
  0x42   : > { %801 = vperm.xlu0 %2456, %v2730_v16  }
  0x45   : > { %816 = vperm.xlu1 %2457, %v2769_v24  }
  0x46   : > { %811 = vperm.xlu0 %2456, %v2750_v21  }
  0x47   : > { %2301 = vmatmul.mubr.msk.bf16.gmra.mrb[20].mxu0 %vm427_vm0, %v2469_v34 }
  0x48   : > { %2304 = vmatprep.mubr.msk.bf16.mxu0 %vm427_vm0, %v2470_v35 }
  0x49   : > { %826 = vperm.xlu1 %2457, %v2782_v27  }
  0x4a   : > { %821 = vperm.xlu0 %2456, %v2764_v23  }
  0x4d   : > { %1191 = vperm.xlu1 %2457, %v2679_v5  }
  0x4e   : > { %1186 = vperm.xlu0 %2456, %v2663_v1  }
  0x4f   : > { %2305 = vmatmul.mubr.msk.bf16.gmra.mrb[24].mxu0 %vm427_vm0, %v2471_v36 }
  0x50   : > { %2308 = vmatprep.mubr.msk.bf16.mxu0 %vm427_vm0, %v2472_v37 }
  0x51   : > { %1201 = vperm.xlu1 %2457, %v2669_v3  }
  0x52   : > { %1196 = vperm.xlu0 %2456, %v2658_v0  }
  0x55   : > { %1211 = vperm.xlu1 %2457, %v2692_v6  }
  0x56   : > { %1206 = vperm.xlu0 %2456, %v2698_v8  }
  0x57   : > { %2309 = vmatmul.mubr.msk.bf16.gmra.mrb[28].mxu0 %vm427_vm0, %v2473_v38 }
  0x58   : > { %2334 = vmatprep.mubr.msk.bf16.mxu0 %vm427_vm0, %v2474_v39 }
  0x59   : > { %1221 = vperm.xlu1 %2457, %v2716_v14  }
  0x5a   : > { %1216 = vperm.xlu0 %2456, %v2721_v15  }
  0x5d   : > { %1231 = vperm.xlu1 %2457, %v2730_v16  }
  0x5e   : > { %1226 = vperm.xlu0 %2456, %v2735_v17  }
  0x5f   : > { %2335 = vmatmul.mubr.msk.bf16.vlgmr.msra.gmra.mrb[32].mxu0 %vm427_vm0, %v2475_v40 }
  0x60   : > { %2371 = vmatpush3.bf16.msra.mxu0 %v1752_v42  ;;  %2338 = vmatprep.mubr.msk.bf16.mxu0 %vm427_vm0, %v2476_v41 }
  0x61   : > { %1241 = vperm.xlu1 %2457, %v2750_v21  }
  0x62   : > { %1236 = vperm.xlu0 %2456, %v2755_v22  }
  0x65   : > { %1251 = vperm.xlu1 %2457, %v2764_v23  }
  0x66   : > { %1246 = vperm.xlu0 %2456, %v2769_v24  }
  0x67   : > { %2339 = vmatmul.mubr.msk.bf16.gmra.mrb[36].mxu0 %vm427_vm0, %v2477_v43 }
  0x68   : > { %2342 = vmatprep.mubr.msk.bf16.mxu0 %vm427_vm0, %v2478_v44 }
  0x69   : > { %1616 = vperm.xlu1 %2457, %v2663_v1   ;;  %v1020_v1 = vld [vmem:[%s3201_s4 + $0x18] sm:$0x3f] }
  0x6a   : > { %1256 = vperm.xlu0 %2456, %v2782_v27  }
  0x6d   : > { %1626 = vperm.xlu1 %2457, %v2658_v0   ;;  %v2490_v0 = vld [vmem:[%s3200_s3] sm:$0xff]  }
  0x6e   : > { %1621 = vperm.xlu0 %2456, %v2679_v5   ;;  %2290 = vmatprep.mubr.msk.bf16.mxu1 %vm613_vm2, %v2490_v0 }
  0x6f   : > { %2343 = vmatmul.mubr.msk.bf16.gmra.mrb[40].mxu0 %vm427_vm0, %v2479_v45 }
  0x70   : > { %2346 = vmatprep.mubr.msk.bf16.mxu0 %vm427_vm0, %v2480_v46 }
  0x71   : > { %1636 = vperm.xlu1 %2457, %v2698_v8  }
  0x72   : > { %1631 = vperm.xlu0 %2456, %v2669_v3   ;;  %v1450_v3 = vld [vmem:[%s3201_s4 + $0x18] sm:$0x3f] }
  0x75   : > { %1646 = vperm.xlu1 %2457, %v2721_v15  }
  0x76   : > { %1641 = vperm.xlu0 %2456, %v2692_v6  }
  0x77   : > { %2347 = vmatmul.mubr.msk.bf16.gmra.mrb[44].mxu0 %vm427_vm0, %v2481_v47 }
  0x78   : > { %2372 = vmatprep.mubr.msk.bf16.mxu0 %vm427_vm0, %v2482_v48 }
  0x79   : > { %1656 = vperm.xlu1 %2457, %v2735_v17  }
  0x7a   : > { %1651 = vperm.xlu0 %2456, %v2716_v14  }
  0x7d   : > { %1666 = vperm.xlu1 %2457, %v2755_v22  }
  0x7e   : > { %1661 = vperm.xlu0 %2456, %v2730_v16  }
  0x7f   : > { %2373 = vmatmul.mubr.msk.bf16.vlgmr.msra.gmra.mrb[48].mxu0 %vm427_vm0, %v2483_v49 }
  0x80   : > { %2376 = vmatprep.mubr.msk.bf16.mxu0 %vm427_vm0, %v2484_v50 }
  0x81   : > { %1676 = vperm.xlu1 %2457, %v2769_v24  }
  0x82   : > { %1671 = vperm.xlu0 %2456, %v2750_v21  }
  0x85   : > { %1686 = vperm.xlu1 %2457, %v2782_v27  }
  0x86   : > { %1681 = vperm.xlu0 %2456, %v2764_v23  }
  0x87   : > { %2377 = vmatmul.mubr.msk.bf16.gmra.mrb[52].mxu0 %vm427_vm0, %v2485_v51 }
  0x88   : > { %2380 = vmatprep.mubr.msk.bf16.mxu0 %vm427_vm0, %v2486_v52 }
  0x89   : > { %590 = vperm.xlu1 %2457, %v580_v53  }
  0x8a   : > { %585 = vperm.xlu0 %2456, %v579_v54  }
  0x8d   : > { %600 = vperm.xlu1 %2457, %v582_v57  }
  0x8e   : > { %595 = vperm.xlu0 %2456, %v581_v58  }
  0x8f   : > { %2381 = vmatmul.mubr.msk.bf16.gmra.mrb[56].mxu0 %vm427_vm0, %v2487_v55 }
  0x90   : > { %2384 = vmatprep.mubr.msk.bf16.mxu0 %vm427_vm0, %v2488_v56  ;;  %v317_v4 = vpop.permute.xlu0 %316  ;;  %v327_v5 = vpop.permute.xlu1 %326 }
  0x91   : > { %688 = vperm.xlu1 %2457, %v678_v59  }
  0x92   : > { %683 = vperm.xlu0 %2456, %v677_v60  }
  0x94   : > { %v322_v6 = vpop.permute.xlu0 %321  ;;  %v332_v8 = vpop.permute.xlu1 %331 }
  0x95   : > { %698 = vperm.xlu1 %2457, %v680_v62  }
  0x96   : > { %693 = vperm.xlu0 %2456, %v679_v63  }
  0x97   : > { %2385 = vmatmul.mubr.msk.bf16.gmra.mrb[60].mxu0 %vm427_vm0, %v2489_v61 }
  0x98   : > { %v337_v11 = vpop.permute.xlu0 %336  ;;  %v342_v12 = vpop.permute.xlu1 %341 }
  0x99   : > { %1028 = vperm.xlu1 %2457, %v580_v53  }
  0x9a   : > { %1023 = vperm.xlu0 %2456, %v579_v54  }
  0x9c   : > { %v352_v14 = vpop.permute.xlu1 %351 }
  0x9d   : > { %1458 = vperm.xlu1 %2457, %v580_v53   ;;  %v347_v13 = vpop.permute.xlu0 %346 }
  0x9e   : > { %1453 = vperm.xlu0 %2456, %v579_v54  }
  0xa0   : > { %v362_v16 = vpop.permute.xlu1 %361 }
  0xa1   : > { %1888 = vperm.xlu1 %2457, %v580_v53   ;;  %v357_v15 = vpop.permute.xlu0 %356 }
  0xa2   : > { %1883 = vperm.xlu0 %2456, %v579_v54  }
  0xa4   : > { %v372_v18 = vpop.permute.xlu1 %371 }
  0xa5   : > { %1463 = vperm.xlu1 %2457, %v581_v58   ;;  %v367_v17 = vpop.permute.xlu0 %366 }
  0xa6   : > { %1033 = vperm.xlu0 %2456, %v581_v58  }
  0xa8   : > { %v2984_v20 = vpop.permute.xlu1 %381 }
  0xa9   : > { %1038 = vperm.xlu1 %2457, %v1020_v1   ;;  %v2982_v19 = vpop.permute.xlu0 %376 }
  0xaa   : > { %1893 = vperm.xlu0 %2456, %v581_v58  }
  0xac   : > { %v2988_v22 = vpop.permute.xlu1 %756 }
  0xad   : > { %1898 = vperm.xlu1 %2457, %v1880_v2   ;;  %v2986_v21 = vpop.permute.xlu0 %386 }
  0xae   : > { %1468 = vperm.xlu0 %2456, %v1450_v3  }
  0xb0   : > { %v2992_v24 = vpop.permute.xlu1 %766 }
  0xb1   : > { %1124 = vperm.xlu1 %2457, %v678_v59   ;;  %v2990_v23 = vpop.permute.xlu0 %761 }
  0xb2   : > { %1119 = vperm.xlu0 %2456, %v677_v60  }
  0xb4   : > { %v2996_v28 = vpop.permute.xlu1 %776 }
  0xb5   : > { %1554 = vperm.xlu1 %2457, %v678_v59   ;;  %v2994_v25 = vpop.permute.xlu0 %771 }
  0xb6   : > { %1549 = vperm.xlu0 %2456, %v677_v60  }
  0xb8   : > { %v3000_v40 = vpop.permute.xlu1 %786 }
  0xb9   : > { %1984 = vperm.xlu1 %2457, %v678_v59   ;;  %v2998_v35 = vpop.permute.xlu0 %781 }
  0xba   : > { %1979 = vperm.xlu0 %2456, %v677_v60  }
  0xbc   : > { %v3004_v52 = vpop.permute.xlu1 %796 }
  0xbd   : > { %1559 = vperm.xlu1 %2457, %v679_v63   ;;  %v3002_v48 = vpop.permute.xlu0 %791 }
  0xbe   : > { %1129 = vperm.xlu0 %2456, %v679_v63  }
  0xc0   : > { %v3008_v1 = vpop.permute.xlu1 %806 }
  0xc1   : > { %1134 = vperm.xlu1 %2457, %v1116_v7   ;;  %v3006_v61 = vpop.permute.xlu0 %801 }
  0xc2   : > { %1989 = vperm.xlu0 %2456, %v679_v63  }
  0xc5   : > { %1994 = vperm.xlu1 %2457, %v1976_v9   ;;  %v3010_v9 = vpop.permute.xlu0 %811 }
  0xc6   : > { %1564 = vperm.xlu0 %2456, %v1546_v10  }
  0xf2   : > { %v2260_v26 = vpop.f32.mrb[0].mxu0 }
  0xf3   : > { %v490_v27 = vpop.f32.mrb[1].mxu0  ;;  %v499_v29 = vadd.f32 %v2260_v26, %v327_v5 }
  0xf4   : > { %v491_v30 = vadd.f32 %v490_v27, %v317_v4  ;;  %v2261_v31 = vpop.f32.mrb[2].mxu0  ;;  %v3017_v27 = vpop.permute.xlu0 %821 }
  0xf5   : > { %v502_v32 = vadd.f32 %v2261_v31, %v332_v8  ;;  %v493_v33 = vpop.f32.mrb[3].mxu0  ;;  %v554_v36 = vmax.f32 %v499_v29, 0.0 }
  0xf6   : > { %v494_v34 = vadd.f32 %v493_v33, %v322_v6  ;;  %v552_v38 = vmax.f32 %v491_v30, 0.0 }
  0xf7   : > { %v555_v37 = vmax.f32 %v502_v32, 0.0 }
  0xf8   : > { %v553_v39 = vmax.f32 %v494_v34, 0.0 }
  0xf9   : > { %v572_v41 = vpack.c.bf16 %v555_v37, %v554_v36 }
  0xfa   : > { %v2264_v42 = vpop.f32.mrb[4].mxu0  ;;  %v571_v44 = vpack.c.bf16 %v553_v39, %v552_v38 }
  0xfb   : > { %v506_v43 = vpop.f32.mrb[5].mxu0  ;;  %v515_v45 = vadd.f32 %v2264_v42, %v347_v13 }
  0xfc   : > { %v507_v46 = vadd.f32 %v506_v43, %v337_v11  ;;  %v2265_v47 = vpop.f32.mrb[6].mxu0  ;;  %2274 = vmatprep.subr.bf16.mxu1 %v571_v44 }
  0xfd   : > { %v518_v49 = vadd.f32 %v2265_v47, %v352_v14  ;;  %v509_v50 = vpop.f32.mrb[7].mxu0  ;;  %2275 = vmatpush3.bf16.msra.mxu1 %v571_v44  ;;  %v558_v53 = vmax.f32 %v515_v45, 0.0  ;;  %v3012_v14 = vpop.permute.xlu1 %816  ;;  %v2491_v47 = vld [vmem:[%s3200_s3 + $0x8] sm:$0x7f]  }
  0xfe   : > { %v510_v51 = vadd.f32 %v509_v50, %v342_v12  ;;  %2276 = vmatprep.subr.bf16.mxu1 %v572_v41  ;;  %v556_v55 = vmax.f32 %v507_v46, 0.0 }
  0xff   : > { %v559_v54 = vmax.f32 %v518_v49, 0.0 }
 0x100   : > { %v557_v56 = vmax.f32 %v510_v51, 0.0 }
 0x101   : > { %v574_v57 = vpack.c.bf16 %v559_v54, %v558_v53  ;;  %2277 = vmatpush3.bf16.msra.mxu1 %v572_v41  ;;  %v3019_v32 = vpop.permute.xlu1 %826 }
 0x102   : > { %v2268_v58 = vpop.f32.mrb[8].mxu0  ;;  %v573_v59 = vpack.c.bf16 %v557_v56, %v556_v55 }
 0x103   : > { %v522_v60 = vpop.f32.mrb[9].mxu0  ;;  %v531_v62 = vadd.f32 %v2268_v58, %v367_v17 }
 0x104   : > { %v523_v63 = vadd.f32 %v522_v60, %v357_v15  ;;  %v2269_v0 = vpop.f32.mrb[10].mxu0  ;;  %2278 = vmatprep.subr.bf16.mxu1 %v573_v59 }
 0x105   : > { %v534_v2 = vadd.f32 %v2269_v0, %v372_v18  ;;  %v525_v3 = vpop.f32.mrb[11].mxu0  ;;  %2279 = vmatpush3.bf16.msra.mxu1 %v573_v59  ;;  %v562_v5 = vmax.f32 %v531_v62, 0.0  ;;  %v3028_v43 = vpop.permute.xlu1 %1191 }
 0x106   : > { %v526_v4 = vadd.f32 %v525_v3, %v362_v16  ;;  %2280 = vmatprep.subr.bf16.mxu1 %v574_v57  ;;  %v560_v7 = vmax.f32 %v523_v63, 0.0 }
 0x107   : > { %v563_v6 = vmax.f32 %v534_v2, 0.0 }
 0x108   : > { %v561_v8 = vmax.f32 %v526_v4, 0.0 }
 0x109   : > { %v576_v10 = vpack.c.bf16 %v563_v6, %v562_v5  ;;  %2281 = vmatpush3.bf16.msra.mxu1 %v574_v57  ;;  %v1202_v57 = vpop.permute.xlu1 %1201 }
 0x10a   : > { %v2272_v11 = vpop.f32.mrb[12].mxu0  ;;  %v575_v12 = vpack.c.bf16 %v561_v8, %v560_v7 }
 0x10b   : > { %v538_v13 = vpop.f32.mrb[13].mxu0  ;;  %v547_v15 = vadd.f32 %v2272_v11, %v2986_v21 }
 0x10c   : > { %v539_v17 = vadd.f32 %v538_v13, %v2982_v19  ;;  %v2273_v18 = vpop.f32.mrb[14].mxu0  ;;  %2282 = vmatprep.subr.bf16.mxu1 %v575_v12 }
 0x10d   : > { %v541_v16 = vpop.f32.mrb[15].mxu0  ;;  %2283 = vmatpush3.bf16.msra.mxu1 %v575_v12  ;;  %v566_v29 = vmax.f32 %v547_v15, 0.0  ;;  %v3045_v6 = vpop.permute.xlu1 %1211 }
 0x10e   : > { %v542_v26 = vadd.f32 %v541_v16, %v2984_v20  ;;  %2284 = vmatprep.subr.bf16.mxu1 %v576_v10  ;;  %v564_v30 = vmax.f32 %v539_v17, 0.0  ;;  %v3023_v20 = vpop.permute.xlu0 %1186 }
 0x10f   : > { %v578_v36 = vpack.c.bf16 %v566_v29, %v566_v29 }
 0x110   : > { %v565_v31 = vmax.f32 %v542_v26, 0.0 }
 0x111   : > { %2285 = vmatpush3.bf16.msra.mxu1 %v576_v10  ;;  %v1222_v16 = vpop.permute.xlu1 %1221 }
 0x112   : > { %v2298_v33 = vpop.f32.mrb[16].mxu0  ;;  %v577_v34 = vpack.c.bf16 %v565_v31, %v564_v30  ;;  %v1197_v53 = vpop.permute.xlu0 %1196 }
 0x113   : > { %v928_v21 = vpop.f32.mrb[17].mxu0  ;;  %v937_v19 = vadd.f32 %v2298_v33, %v2992_v24 }
 0x114   : > { %v929_v37 = vadd.f32 %v928_v21, %v2988_v22  ;;  %2286 = vmatprep.subr.bf16.mxu1 %v577_v34  ;;  %v2299_v38 = vpop.f32.mrb[18].mxu0  ;;  %v622_v22 = vsel %vm620_vm3, %v578_v36, 0 }
 0x115   : > { %v940_v39 = vadd.f32 %v2299_v38, %v2994_v25  ;;  %2287 = vmatpush3.bf16.msra.mxu1 %v577_v34  ;;  %v931_v41 = vpop.f32.mrb[19].mxu0  ;;  %v992_v44 = vmax.f32 %v937_v19, 0.0  ;;  %v3054_v21 = vpop.permute.xlu1 %1231 }
 0x116   : > { %v932_v42 = vadd.f32 %v931_v41, %v2990_v23  ;;  %2409 = vmatprep.subr.msk.bf16.mxu1 %vm620_vm3, %v578_v36  ;;  %v990_v45 = vmax.f32 %v929_v37, 0.0  ;;  %v2492_v23 = vld [vmem:[%s3200_s3] sm:$0xff]   ;;  %v3043_v2 = vpop.permute.xlu0 %1206 }
 0x117   : > { %v993_v24 = vmax.f32 %v940_v39, 0.0 }
 0x118   : > { %v991_v46 = vmax.f32 %v932_v42, 0.0 }
 0x119   : > { %v1010_v25 = vpack.c.bf16 %v993_v24, %v992_v44  ;;  %2289 = vmatpush3.bf16.msra.mxu1 %v622_v22 }
 0x11a   : > { %v2302_v49 = vpop.f32.mrb[20].mxu0  ;;  %v1009_v50 = vpack.c.bf16 %v991_v46, %v990_v45  ;;  %v1217_v12 = vpop.permute.xlu0 %1216 }
 0x11b   : > { %v944_v51 = vpop.f32.mrb[21].mxu0  ;;  %v953_v54 = vadd.f32 %v2302_v49, %v3000_v40  ;;  %v1242_v45 = vpop.permute.xlu1 %1241 }
 0x11c   : > { %v945_v55 = vadd.f32 %v944_v51, %v2996_v28  ;;  %2291 = vmatmul.mubr.msk.bf16.vlgmr.msra.gmra.mrb[0].mxu1 %vm613_vm2, %v2491_v47  ;;  %v2303_v56 = vpop.f32.mrb[22].mxu0  ;;  %2312 = vmatprep.subr.bf16.mxu1 %v1009_v50 }
 0x11d   : > { %v956_v58 = vadd.f32 %v2303_v56, %v3002_v48  ;;  %v947_v59 = vpop.f32.mrb[23].mxu0  ;;  %2313 = vmatpush3.bf16.msra.mxu1 %v1009_v50  ;;  %2328 = vmatprep.mubr.msk.bf16.mxu1 %vm613_vm2, %v2492_v23  ;;  %v996_v62 = vmax.f32 %v953_v54, 0.0 }
 0x11e   : > { %v948_v60 = vadd.f32 %v947_v59, %v2998_v35  ;;  %2314 = vmatprep.subr.bf16.mxu1 %v1010_v25  ;;  %v994_v0 = vmax.f32 %v945_v55, 0.0  ;;  %v1227_v33 = vpop.permute.xlu0 %1226 }
 0x11f   : > { %v997_v63 = vmax.f32 %v956_v58, 0.0 }
 0x120   : > { %v995_v40 = vmax.f32 %v948_v60, 0.0 }
 0x121   : > { %v1012_v28 = vpack.c.bf16 %v997_v63, %v996_v62  ;;  %2315 = vmatpush3.bf16.msra.mxu1 %v1010_v25 }
 0x122   : > { %v2306_v3 = vpop.f32.mrb[24].mxu0  ;;  %v1011_v4 = vpack.c.bf16 %v995_v40, %v994_v0 }
 0x123   : > { %v960_v5 = vpop.f32.mrb[25].mxu0  ;;  %v969_v48 = vadd.f32 %v2306_v3, %v3008_v1 }
 0x124   : > { %v961_v7 = vadd.f32 %v960_v5, %v3004_v52  ;;  %v2307_v8 = vpop.f32.mrb[26].mxu0  ;;  %2316 = vmatprep.subr.bf16.mxu1 %v1011_v4 }
 0x125   : > { %v972_v35 = vadd.f32 %v2307_v8, %v3010_v9  ;;  %v963_v10 = vpop.f32.mrb[27].mxu0  ;;  %2317 = vmatpush3.bf16.msra.mxu1 %v1011_v4  ;;  %v1000_v13 = vmax.f32 %v969_v48, 0.0 }
 0x126   : > { %v964_v11 = vadd.f32 %v963_v10, %v3006_v61  ;;  %2318 = vmatprep.subr.bf16.mxu1 %v1012_v28  ;;  %v998_v17 = vmax.f32 %v961_v7, 0.0 }
 0x127   : > { %v1001_v15 = vmax.f32 %v972_v35, 0.0 }
 0x128   : > { %v999_v18 = vmax.f32 %v964_v11, 0.0 }
 0x129   : > { %v1014_v26 = vpack.c.bf16 %v1001_v15, %v1000_v13  ;;  %2319 = vmatpush3.bf16.msra.mxu1 %v1012_v28 }
 0x12a   : > { %v2310_v1 = vpop.f32.mrb[28].mxu0  ;;  %v1013_v29 = vpack.c.bf16 %v999_v18, %v998_v17 }
 0x12b   : > { %v976_v52 = vpop.f32.mrb[29].mxu0  ;;  %v985_v30 = vadd.f32 %v2310_v1, %v3019_v32  ;;  %v1237_v32 = vpop.permute.xlu0 %1236 }
 0x12c   : > { %v977_v9 = vadd.f32 %v976_v52, %v3012_v14  ;;  %v2311_v31 = vpop.f32.mrb[30].mxu0  ;;  %2320 = vmatprep.subr.bf16.mxu1 %v1013_v29 }
 0x12d   : > { %v979_v61 = vpop.f32.mrb[31].mxu0  ;;  %2321 = vmatpush3.bf16.msra.mxu1 %v1013_v29  ;;  %v1004_v19 = vmax.f32 %v985_v30, 0.0 }
 0x12e   : > { %v980_v34 = vadd.f32 %v979_v61, %v3017_v27  ;;  %2322 = vmatprep.subr.bf16.mxu1 %v1014_v26  ;;  %v1002_v36 = vmax.f32 %v977_v9, 0.0 }
 0x12f   : > { %v1016_v14 = vpack.c.bf16 %v1004_v19, %v1004_v19  ;;  %v1247_v51 = vpop.permute.xlu0 %1246 }
 0x130   : > { %v1003_v37 = vmax.f32 %v980_v34, 0.0 }
 0x131   : > { %2323 = vmatpush3.bf16.msra.mxu1 %v1014_v26  ;;  %v1058_v50 = vsel %vm620_vm3, %v1016_v14, 0 }
 0x132   : > { %v2336_v38 = vpop.f32.mrb[32].mxu0  ;;  %v1015_v39 = vpack.c.bf16 %v1003_v37, %v1002_v36 }
 0x133   : > { %v1358_v41 = vpop.f32.mrb[33].mxu0  ;;  %v1367_v42 = vadd.f32 %v2336_v38, %v1197_v53  ;;  %v1257_v40 = vpop.permute.xlu0 %1256 }
 0x134   : > { %v1359_v44 = vadd.f32 %v1358_v41, %v3023_v20  ;;  %2324 = vmatprep.subr.bf16.mxu1 %v1015_v39  ;;  %v2337_v24 = vpop.f32.mrb[34].mxu0  ;;  %v2493_v20 = vld [vmem:[%s3200_s3 + $0x8] sm:$0x7f]  }
 0x135   : > { %v1370_v46 = vadd.f32 %v2337_v24, %v1202_v57  ;;  %2325 = vmatpush3.bf16.msra.mxu1 %v1015_v39  ;;  %v1361_v27 = vpop.f32.mrb[35].mxu0  ;;  %v1422_v47 = vmax.f32 %v1367_v42, 0.0  ;;  %v1252_v57 = vpop.permute.xlu1 %1251 }
 0x136   : > { %v1362_v22 = vadd.f32 %v1361_v27, %v3028_v43  ;;  %2411 = vmatprep.subr.msk.bf16.mxu1 %vm620_vm3, %v1016_v14  ;;  %v1420_v49 = vmax.f32 %v1359_v44, 0.0  ;;  %v2494_v43 = vld [vmem:[%s3200_s3] sm:$0xff]  }
 0x137   : > { %v1423_v25 = vmax.f32 %v1370_v46, 0.0  ;;  %v1622_v13 = vpop.permute.xlu0 %1621 }
 0x138   : > { %v1421_v23 = vmax.f32 %v1362_v22, 0.0 }
 0x139   : > { %v1440_v53 = vpack.c.bf16 %v1423_v25, %v1422_v47  ;;  %2327 = vmatpush3.bf16.msra.mxu1 %v1058_v50  ;;  %v1617_v48 = vpop.permute.xlu1 %1616 }
 0x13a   : > { %v2340_v54 = vpop.f32.mrb[36].mxu0  ;;  %v1439_v55 = vpack.c.bf16 %v1421_v23, %v1420_v49 }
 0x13b   : > { %v1374_v56 = vpop.f32.mrb[37].mxu0  ;;  %v1383_v58 = vadd.f32 %v2340_v54, %v1217_v12 }
 0x13c   : > { %v1375_v59 = vadd.f32 %v1374_v56, %v3043_v2  ;;  %2329 = vmatmul.mubr.msk.bf16.vlgmr.msra.gmra.mrb[4].mxu1 %vm613_vm2, %v2493_v20  ;;  %v2341_v60 = vpop.f32.mrb[38].mxu0  ;;  %2350 = vmatprep.subr.bf16.mxu1 %v1439_v55 }
 0x13d   : > { %v1386_v62 = vadd.f32 %v2341_v60, %v1222_v16  ;;  %v1377_v63 = vpop.f32.mrb[39].mxu0  ;;  %2351 = vmatpush3.bf16.msra.mxu1 %v1439_v55  ;;  %2366 = vmatprep.mubr.msk.bf16.mxu1 %vm613_vm2, %v2494_v43  ;;  %v1426_v28 = vmax.f32 %v1383_v58, 0.0  ;;  %v1627_v18 = vpop.permute.xlu1 %1626  ;;  %v2495_v55 = vld [vmem:[%s3200_s3 + $0x8] sm:$0x7f]  }
 0x13e   : > { %v1378_v0 = vadd.f32 %v1377_v63, %v3045_v6  ;;  %2352 = vmatprep.subr.bf16.mxu1 %v1440_v53  ;;  %v1424_v4 = vmax.f32 %v1375_v59, 0.0  ;;  %v2496_v59 = vld [vmem:[%s3200_s3] sm:$0xff]  }
 0x13f   : > { %v1427_v3 = vmax.f32 %v1386_v62, 0.0 }
 0x140   : > { %v1425_v5 = vmax.f32 %v1378_v0, 0.0 }
 0x141   : > { %v1442_v7 = vpack.c.bf16 %v1427_v3, %v1426_v28  ;;  %2353 = vmatpush3.bf16.msra.mxu1 %v1440_v53  ;;  %v1637_v37 = vpop.permute.xlu1 %1636 }
 0x142   : > { %v2344_v2 = vpop.f32.mrb[40].mxu0  ;;  %v1441_v8 = vpack.c.bf16 %v1425_v5, %v1424_v4 }
 0x143   : > { %v1390_v35 = vpop.f32.mrb[41].mxu0  ;;  %v1399_v10 = vadd.f32 %v2344_v2, %v1237_v32 }
 0x144   : > { %v1391_v11 = vadd.f32 %v1390_v35, %v1227_v33  ;;  %v2345_v12 = vpop.f32.mrb[42].mxu0  ;;  %2354 = vmatprep.subr.bf16.mxu1 %v1441_v8  ;;  %v1632_v33 = vpop.permute.xlu0 %1631 }
 0x145   : > { %v1402_v15 = vadd.f32 %v2345_v12, %v1242_v45  ;;  %v1393_v17 = vpop.f32.mrb[43].mxu0  ;;  %2355 = vmatpush3.bf16.msra.mxu1 %v1441_v8  ;;  %v1430_v16 = vmax.f32 %v1399_v10, 0.0  ;;  %v1647_v45 = vpop.permute.xlu1 %1646 }
 0x146   : > { %v1394_v6 = vadd.f32 %v1393_v17, %v3054_v21  ;;  %2356 = vmatprep.subr.bf16.mxu1 %v1442_v7  ;;  %v1428_v1 = vmax.f32 %v1391_v11, 0.0 }
 0x147   : > { %v1431_v26 = vmax.f32 %v1402_v15, 0.0 }
 0x148   : > { %v1429_v29 = vmax.f32 %v1394_v6, 0.0  ;;  %v1642_v32 = vpop.permute.xlu0 %1641 }
 0x149   : > { %v1444_v52 = vpack.c.bf16 %v1431_v26, %v1430_v16  ;;  %2357 = vmatpush3.bf16.msra.mxu1 %v1442_v7  ;;  %v1657_v56 = vpop.permute.xlu1 %1656 }
 0x14a   : > { %v2348_v30 = vpop.f32.mrb[44].mxu0  ;;  %v1443_v9 = vpack.c.bf16 %v1429_v29, %v1428_v1 }
 0x14b   : > { %v1406_v31 = vpop.f32.mrb[45].mxu0  ;;  %v1415_v19 = vadd.f32 %v2348_v30, %v1257_v40 }
 0x14c   : > { %v1407_v61 = vadd.f32 %v1406_v31, %v1247_v51  ;;  %v2349_v34 = vpop.f32.mrb[46].mxu0  ;;  %2358 = vmatprep.subr.bf16.mxu1 %v1443_v9  ;;  %v1652_v20 = vpop.permute.xlu0 %1651 }
 0x14d   : > { %v1409_v36 = vpop.f32.mrb[47].mxu0  ;;  %2359 = vmatpush3.bf16.msra.mxu1 %v1443_v9  ;;  %v1434_v41 = vmax.f32 %v1415_v19, 0.0  ;;  %v1667_v7 = vpop.permute.xlu1 %1666 }
 0x14e   : > { %v1410_v38 = vadd.f32 %v1409_v36, %v1252_v57  ;;  %2360 = vmatprep.subr.bf16.mxu1 %v1444_v52  ;;  %v1432_v21 = vmax.f32 %v1407_v61, 0.0 }
 0x14f   : > { %v1446_v22 = vpack.c.bf16 %v1434_v41, %v1434_v41 }
 0x150   : > { %v1433_v39 = vmax.f32 %v1410_v38, 0.0  ;;  %v1662_v3 = vpop.permute.xlu0 %1661 }
 0x151   : > { %2361 = vmatpush3.bf16.msra.mxu1 %v1444_v52  ;;  %v1488_v43 = vsel %vm620_vm3, %v1446_v22, 0  ;;  %v1677_v26 = vpop.permute.xlu1 %1676 }
 0x152   : > { %v1445_v42 = vpack.c.bf16 %v1433_v39, %v1432_v21  ;;  %v2374_v14 = vpop.f32.mrb[48].mxu0 }
 0x153   : > { %v1797_v44 = vadd.f32 %v2374_v14, %v1627_v18  ;;  %v1788_v24 = vpop.f32.mrb[49].mxu0 }
 0x154   : > { %v1789_v46 = vadd.f32 %v1788_v24, %v1617_v48  ;;  %2362 = vmatprep.subr.bf16.mxu1 %v1445_v42  ;;  %v2375_v27 = vpop.f32.mrb[50].mxu0  ;;  %v1672_v15 = vpop.permute.xlu0 %1671 }
 0x155   : > { %v1800_v47 = vadd.f32 %v2375_v27, %v1632_v33  ;;  %v1791_v25 = vpop.f32.mrb[51].mxu0  ;;  %2363 = vmatpush3.bf16.msra.mxu1 %v1445_v42  ;;  %v1852_v23 = vmax.f32 %v1797_v44, 0.0  ;;  %v1687_v19 = vpop.permute.xlu1 %1686 }
 0x156   : > { %v1792_v49 = vadd.f32 %v1791_v25, %v1622_v13  ;;  %2413 = vmatprep.subr.msk.bf16.mxu1 %vm620_vm3, %v1446_v22  ;;  %v1850_v51 = vmax.f32 %v1789_v46, 0.0  ;;  %v2497_v46 = vld [vmem:[%s3200_s3 + $0x8] sm:$0x7f]  }
 0x157   : > { %v1853_v50 = vmax.f32 %v1800_v47, 0.0 }
 0x158   : > { %v1851_v53 = vmax.f32 %v1792_v49, 0.0  ;;  %v1682_v38 = vpop.permute.xlu0 %1681 }
 0x159   : > { %v1870_v54 = vpack.c.bf16 %v1853_v50, %v1852_v23  ;;  %2365 = vmatpush3.bf16.msra.mxu1 %v1488_v43  ;;  %v591_v27 = vpop.permute.xlu1 %590 }
 0x15a   : > { %v1869_v57 = vpack.c.bf16 %v1851_v53, %v1850_v51  ;;  %v2378_v58 = vpop.f32.mrb[52].mxu0 }
 0x15b   : > { %v1813_v60 = vadd.f32 %v2378_v58, %v1647_v45  ;;  %v1804_v62 = vpop.f32.mrb[53].mxu0 }
 0x15c   : > { %v1805_v63 = vadd.f32 %v1804_v62, %v1637_v37  ;;  %v2379_v0 = vpop.f32.mrb[54].mxu0  ;;  %2388 = vmatprep.subr.bf16.mxu1 %v1869_v57  ;;  %2367 = vmatmul.mubr.msk.bf16.vlgmr.msra.gmra.mrb[8].mxu1 %vm613_vm2, %v2495_v55  ;;  %v586_v47 = vpop.permute.xlu0 %585 }
 0x15d   : > { %v1816_v40 = vadd.f32 %v2379_v0, %v1652_v20  ;;  %v1807_v28 = vpop.f32.mrb[55].mxu0  ;;  %2389 = vmatpush3.bf16.msra.mxu1 %v1869_v57  ;;  %2404 = vmatprep.mubr.msk.bf16.mxu1 %vm613_vm2, %v2496_v59  ;;  %v1856_v5 = vmax.f32 %v1813_v60, 0.0  ;;  %v601_v22 = vpop.permute.xlu1 %600 }
 0x15e   : > { %v1808_v4 = vadd.f32 %v1807_v28, %v1642_v32  ;;  %2390 = vmatprep.subr.bf16.mxu1 %v1870_v54  ;;  %v1854_v2 = vmax.f32 %v1805_v63, 0.0 }
 0x15f   : > { %v1857_v48 = vmax.f32 %v1816_v40, 0.0 }
 0x160   : > { %v1855_v8 = vmax.f32 %v1808_v4, 0.0  ;;  %v596_v49 = vpop.permute.xlu0 %595 }
 0x161   : > { %v1872_v35 = vpack.c.bf16 %v1857_v48, %v1856_v5  ;;  %2391 = vmatpush3.bf16.msra.mxu1 %v1870_v54  ;;  %v689_v25 = vpop.permute.xlu1 %688 }
 0x162   : > { %v1871_v10 = vpack.c.bf16 %v1855_v8, %v1854_v2  ;;  %v2382_v11 = vpop.f32.mrb[56].mxu0 }
 0x163   : > { %v1829_v12 = vadd.f32 %v2382_v11, %v1667_v7  ;;  %v1820_v13 = vpop.f32.mrb[57].mxu0 }
 0x164   : > { %v1821_v17 = vadd.f32 %v1820_v13, %v1657_v56  ;;  %v2383_v6 = vpop.f32.mrb[58].mxu0  ;;  %2392 = vmatprep.subr.bf16.mxu1 %v1871_v10  ;;  %v684_v50 = vpop.permute.xlu0 %683 }
 0x165   : > { %v1832_v18 = vadd.f32 %v2383_v6, %v1672_v15  ;;  %v1823_v16 = vpop.f32.mrb[59].mxu0  ;;  %2393 = vmatpush3.bf16.msra.mxu1 %v1871_v10  ;;  %v1860_v29 = vmax.f32 %v1829_v12, 0.0  ;;  %v699_v23 = vpop.permute.xlu1 %698 }
 0x166   : > { %v1824_v1 = vadd.f32 %v1823_v16, %v1662_v3  ;;  %2394 = vmatprep.subr.bf16.mxu1 %v1872_v35  ;;  %v1858_v30 = vmax.f32 %v1821_v17, 0.0 }
 0x167   : > { %v1861_v52 = vmax.f32 %v1832_v18, 0.0 }
 0x168   : > { %v1859_v9 = vmax.f32 %v1824_v1, 0.0  ;;  %v694_v51 = vpop.permute.xlu0 %693 }
 0x169   : > { %v1874_v31 = vpack.c.bf16 %v1861_v52, %v1860_v29  ;;  %2395 = vmatpush3.bf16.msra.mxu1 %v1872_v35  ;;  %v3087_v20 = vpop.permute.xlu1 %1028 }
 0x16a   : > { %v1873_v33 = vpack.c.bf16 %v1859_v9, %v1858_v30  ;;  %v2386_v61 = vpop.f32.mrb[60].mxu0 }
 0x16b   : > { %v1836_v34 = vpop.f32.mrb[61].mxu0  ;;  %v1845_v21 = vadd.f32 %v2386_v61, %v1687_v19 }
 0x16c   : > { %v1837_v36 = vadd.f32 %v1836_v34, %v1677_v26  ;;  %v2387_v37 = vpop.f32.mrb[62].mxu0  ;;  %2396 = vmatprep.subr.bf16.mxu1 %v1873_v33  ;;  %v1024_v54 = vpop.permute.xlu0 %1023  ;;  %v3107_v34 = vstv %s282_s24 }
 0x16d   : > { %v1839_v39 = vpop.f32.mrb[63].mxu0  ;;  %2397 = vmatpush3.bf16.msra.mxu1 %v1873_v33  ;;  %v1864_v14 = vmax.f32 %v1845_v21, 0.0  ;;  %v3089_v53 = vpop.permute.xlu1 %1458  ;;  %v718_v33 = vlaneseq }
 0x16e   : > { %v1840_v41 = vadd.f32 %v1839_v39, %v1682_v38  ;;  %2398 = vmatprep.subr.bf16.mxu1 %v1874_v31  ;;  %v1862_v32 = vmax.f32 %v1837_v36, 0.0 }
 0x16f   : > { %v1876_v24 = vpack.c.bf16 %v1864_v14, %v1864_v14  ;;  %vm3109_vm5 = vcmp.lt.s32.totalorder %v718_v33, 128 }
 0x170   : > { %v1863_v42 = vmax.f32 %v1840_v41, 0.0  ;;  %v3093_v55 = vpop.permute.xlu0 %1453 }
 0x171   : > { %2399 = vmatpush3.bf16.msra.mxu1 %v1874_v31  ;;  %v1918_v45 = vsel %vm620_vm3, %v1876_v24, 0  ;;  %v3091_v43 = vpop.permute.xlu1 %1888 }
 0x172   : > { %v1875_v44 = vpack.c.bf16 %v1863_v42, %v1862_v32 }
 0x174   : > { %2400 = vmatprep.subr.bf16.mxu1 %v1875_v44  ;;  %v3097_v57 = vpop.permute.xlu0 %1883 }
 0x175   : > { %2401 = vmatpush3.bf16.msra.mxu1 %v1875_v44  ;;  %v3095_v56 = vpop.permute.xlu1 %1463 }
 0x176   : > { %2415 = vmatprep.subr.msk.bf16.mxu1 %vm620_vm3, %v1876_v24 }
 0x178   : > { %v1034_v5 = vpop.permute.xlu0 %1033 }
 0x179   : > { %2403 = vmatpush3.bf16.msra.mxu1 %v1918_v45  ;;  %v1039_v28 = vpop.permute.xlu1 %1038 }
 0x17c   : > { %2405 = vmatmul.mubr.msk.bf16.vlgmr.msra.gmra.mrb[12].mxu1 %vm613_vm2, %v2497_v46  ;;  %v3101_v15 = vpop.permute.xlu0 %1893 }
 0x17d   : > { %v3099_v11 = vpop.permute.xlu1 %1898 }
 0x180   : > { %v1469_v1 = vpop.permute.xlu0 %1468 }
 0x181   : > { %v1125_v16 = vpop.permute.xlu1 %1124 }
 0x184   : > { %v1120_v31 = vpop.permute.xlu0 %1119 }
 0x185   : > { %v1555_v30 = vpop.permute.xlu1 %1554 }
 0x188   : > { %v1550_v21 = vpop.permute.xlu0 %1549 }
 0x189   : > { %v3113_v37 = vpop.permute.xlu1 %1984 }
 0x18c   : > { %v3121_v24 = vpop.permute.xlu0 %1979 }
 0x18d   : > { %v1560_v32 = vpop.permute.xlu1 %1559 }
 0x1ef   : > { %v2292_v58 = vpop.f32.mrb[0].mxu1 }
 0x1f0   : > { %v658_v59 = vpop.f32.mrb[1].mxu1  ;;  %v667_v60 = vadd.f32 %v2292_v58, %v596_v49  ;;  %v1130_v58 = vpop.permute.xlu0 %1129 }
 0x1f1   : > { %v659_v62 = vadd.f32 %v658_v59, %v586_v47  ;;  %v2293_v63 = vpop.f32.mrb[2].mxu1 }
 0x1f2   : > { %v670_v0 = vadd.f32 %v2293_v63, %v601_v22  ;;  %v661_v40 = vpop.f32.mrb[3].mxu1  ;;  %v675_v7 = vmax.f32 %v667_v60, 0.0 }
 0x1f3   : > { %v673_v3 = vmax.f32 %v659_v62, 0.0  ;;  %v662_v4 = vadd.f32 %v661_v40, %v591_v27 }
 0x1f4   : > { %v676_v48 = vmax.f32 %v670_v0, 0.0  ;;  %v703_v12 = vmul.f32 %v694_v51, %v675_v7 }
 0x1f5   : > { %v674_v2 = vmax.f32 %v662_v4, 0.0  ;;  %v701_v8 = vmul.f32 %v684_v50, %v673_v3 }
 0x1f6   : > { %v704_v10 = vmul.f32 %v699_v23, %v676_v48  ;;  %v1135_v23 = vpop.permute.xlu1 %1134 }
 0x1f7   : > { %v702_v35 = vmul.f32 %v689_v25, %v674_v2 }
 0x1f8   : > { %v708_v6 = vsel %vm707_vm4, %v704_v10, 0.0 }
 0x1f9   : > { %v705_v13 = vadd.f32 %v702_v35, %v701_v8  ;;  %v1990_v8 = vpop.permute.xlu0 %1989 }
 0x1fb   : > { %v706_v17 = vadd.f32 %v705_v13, %v703_v12 }
 0x1fd   : > { %v709_v18 = vadd.f32 %v708_v6, %v706_v17 }
 0x1ff   : > { %v710_v26 = vrot.slane %v709_v18, 4 }
 0x201   : > { %v711_v29 = vadd.f32 %v710_v26, %v709_v18 }
 0x203   : > { %v712_v52 = vrot.slane %v711_v29, 2 }
 0x205   : > { %v713_v9 = vadd.f32 %v712_v52, %v711_v29  ;;  %v1565_v52 = vpop.permute.xlu0 %1564 }
 0x207   : > { %v714_v61 = vrot.slane %v713_v9, 1 }
 0x209   : > { %v715_v19 = vadd.f32 %v714_v61, %v713_v9 }
 0x20b   : > { %v717_v38 = vadd.f32 %v3107_v34, %v715_v19 }
 0x20d   : > { %722 = vst.msk [vmem:[%s3116_s9] sm:$0x1] %vm3109_vm5, %v717_v38 }
 0x20f   : > { %v2330_v39 = vpop.f32.mrb[4].mxu1 }
 0x210   : > { %v1094_v41 = vpop.f32.mrb[5].mxu1  ;;  %v1103_v42 = vadd.f32 %v2330_v39, %v1034_v5 }
 0x211   : > { %v1095_v14 = vadd.f32 %v1094_v41, %v1024_v54  ;;  %v2331_v44 = vpop.f32.mrb[6].mxu1 }
 0x212   : > { %v1106_v45 = vadd.f32 %v2331_v44, %v1039_v28  ;;  %v1097_v46 = vpop.f32.mrb[7].mxu1  ;;  %v1111_v25 = vmax.f32 %v1103_v42, 0.0 }
 0x213   : > { %v1109_v27 = vmax.f32 %v1095_v14, 0.0  ;;  %v1098_v22 = vadd.f32 %v1097_v46, %v3087_v20 }
 0x214   : > { %v1112_v47 = vmax.f32 %v1106_v45, 0.0  ;;  %v1139_v60 = vmul.f32 %v1130_v58, %v1111_v25  ;;  %v1995_v58 = vpop.permute.xlu1 %1994 }
 0x215   : > { %v1110_v49 = vmax.f32 %v1098_v22, 0.0  ;;  %v1137_v50 = vmul.f32 %v1120_v31, %v1109_v27 }
 0x216   : > { %v1140_v59 = vmul.f32 %v1135_v23, %v1112_v47 }
 0x217   : > { %v1138_v51 = vmul.f32 %v1125_v16, %v1110_v49 }
 0x218   : > { %v1143_v63 = vsel %vm707_vm4, %v1140_v59, 0.0 }
 0x219   : > { %v1141_v62 = vadd.f32 %v1138_v51, %v1137_v50 }
 0x21b   : > { %v1142_v54 = vadd.f32 %v1141_v62, %v1139_v60 }
 0x21d   : > { %v1144_v0 = vadd.f32 %v1143_v63, %v1142_v54 }
 0x21f   : > { %v1145_v40 = vrot.slane %v1144_v0, 4 }
 0x221   : > { %v1146_v28 = vadd.f32 %v1145_v40, %v1144_v0 }
 0x223   : > { %v1147_v3 = vrot.slane %v1146_v28, 2 }
 0x225   : > { %v1148_v4 = vadd.f32 %v1147_v3, %v1146_v28 }
 0x227   : > { %v1149_v20 = vrot.slane %v1148_v4, 1 }
 0x229   : > { %v1150_v5 = vadd.f32 %v1149_v20, %v1148_v4 }
 0x22b   : > { %v1151_v48 = vadd.f32 %v1150_v5, %v3107_v34 }
 0x22d   : > { %1152 = vst.msk [vmem:[%s3116_s9 + $0x1] sm:$0x1] %vm3109_vm5, %v1151_v48 }
 0x22f   : > { %v2368_v7 = vpop.f32.mrb[8].mxu1 }
 0x230   : > { %v1524_v2 = vpop.f32.mrb[9].mxu1  ;;  %v1533_v35 = vadd.f32 %v2368_v7, %v3095_v56 }
 0x231   : > { %v1525_v10 = vadd.f32 %v1524_v2, %v3093_v55  ;;  %v2369_v12 = vpop.f32.mrb[10].mxu1 }
 0x232   : > { %v1536_v13 = vadd.f32 %v2369_v12, %v1469_v1  ;;  %v1527_v17 = vpop.f32.mrb[11].mxu1  ;;  %v1541_v26 = vmax.f32 %v1533_v35, 0.0 }
 0x233   : > { %v1539_v6 = vmax.f32 %v1525_v10, 0.0  ;;  %v1528_v18 = vadd.f32 %v1527_v17, %v3089_v53 }
 0x234   : > { %v1542_v16 = vmax.f32 %v1536_v13, 0.0  ;;  %v1569_v61 = vmul.f32 %v1560_v32, %v1541_v26 }
 0x235   : > { %v1540_v29 = vmax.f32 %v1528_v18, 0.0  ;;  %v1567_v9 = vmul.f32 %v1550_v21, %v1539_v6 }
 0x236   : > { %v1570_v33 = vmul.f32 %v1565_v52, %v1542_v16 }
 0x237   : > { %v1568_v31 = vmul.f32 %v1555_v30, %v1540_v29 }
 0x238   : > { %v1573_v56 = vsel %vm707_vm4, %v1570_v33, 0.0 }
 0x239   : > { %v1571_v19 = vadd.f32 %v1568_v31, %v1567_v9 }
 0x23b   : > { %v1572_v38 = vadd.f32 %v1571_v19, %v1569_v61 }
 0x23d   : > { %v1574_v55 = vadd.f32 %v1573_v56, %v1572_v38 }
 0x23f   : > { %v1575_v39 = vrot.slane %v1574_v55, 4 }
 0x241   : > { %v1576_v1 = vadd.f32 %v1575_v39, %v1574_v55 }
 0x243   : > { %v1577_v41 = vrot.slane %v1576_v1, 2 }
 0x245   : > { %v1578_v42 = vadd.f32 %v1577_v41, %v1576_v1 }
 0x247   : > { %v1579_v14 = vrot.slane %v1578_v42, 1 }
 0x249   : > { %v1580_v53 = vadd.f32 %v1579_v14, %v1578_v42 }
 0x24b   : > { %v1581_v44 = vadd.f32 %v1580_v53, %v3107_v34 }
 0x24d   : > { %1582 = vst.msk [vmem:[%s3116_s9 + $0x2] sm:$0x1] %vm3109_vm5, %v1581_v44 }
 0x24f   : > { %v2406_v21 = vpop.f32.mrb[12].mxu1 }
 0x250   : > { %v1954_v30 = vpop.f32.mrb[13].mxu1  ;;  %v1963_v32 = vadd.f32 %v2406_v21, %v3101_v15 }
 0x251   : > { %v1955_v45 = vadd.f32 %v1954_v30, %v3097_v57  ;;  %v2407_v46 = vpop.f32.mrb[14].mxu1 }
 0x252   : > { %v1966_v27 = vadd.f32 %v2407_v46, %v3099_v11  ;;  %v1957_v22 = vpop.f32.mrb[15].mxu1  ;;  %v1971_v23 = vmax.f32 %v1963_v32, 0.0 }
 0x253   : > { %v1969_v47 = vmax.f32 %v1955_v45, 0.0  ;;  %v1958_v25 = vadd.f32 %v1957_v22, %v3091_v43 }
 0x254   : > { %v1972_v49 = vmax.f32 %v1966_v27, 0.0  ;;  %v1999_v60 = vmul.f32 %v1990_v8, %v1971_v23 }
 0x255   : > { %v1997_v50 = vmul.f32 %v3121_v24, %v1969_v47  ;;  %v1970_v51 = vmax.f32 %v1958_v25, 0.0 }
 0x256   : > { %v2000_v15 = vmul.f32 %v1995_v58, %v1972_v49 }
 0x257   : > { %v1998_v59 = vmul.f32 %v3113_v37, %v1970_v51 }
 0x258   : > { %v2003_v62 = vsel %vm707_vm4, %v2000_v15, 0.0 }
 0x259   : > { %v2001_v57 = vadd.f32 %v1998_v59, %v1997_v50 }
 0x25b   : > { %v2002_v11 = vadd.f32 %v2001_v57, %v1999_v60 }
 0x25d   : > { %v2004_v54 = vadd.f32 %v2003_v62, %v2002_v11 }
 0x25f   : > { %v2005_v43 = vrot.slane %v2004_v54, 4 }
 0x261   : > { %v2006_v63 = vadd.f32 %v2005_v43, %v2004_v54 }
 0x263   : > { %v2007_v0 = vrot.slane %v2006_v63, 2 }
 0x265   : > { %v2008_v40 = vadd.f32 %v2007_v0, %v2006_v63 }
 0x267   : > { %v2009_v24 = vrot.slane %v2008_v40, 1 }
 0x269   : > { %v2010_v28 = vadd.f32 %v2009_v24, %v2008_v40 }
 0x26b   : > { %v2011_v37 = vadd.f32 %v2010_v28, %v3107_v34 }
 0x26d   : > { %2012 = vst.msk [vmem:[%s3116_s9 + $0x3] sm:$0x1] %vm3109_vm5, %v2011_v37 }
 0x26e   : > { %2511 = shalt.err (!%p2508_p3)
}
 0x26f   : > { %s2512_s22 = scalar_lea.hbm %s3150_s10, 64  ;;  %s2516_s25 = scalar_lea.hbm %s3204_s7, 128 }
 0x270   : > { %p2513_p4 = scmp.ne.s32.totalorder %s3150_s10, %s2512_s22  ;;  %p2517_p9 = scmp.lt.u32.totalorder %s3150_s10, %s3204_s7 }
 0x271   : > { %p2518_p10 = scmp.lt.u32.totalorder %s2516_s25, %s2512_s22  ;;  %p2520_p12 = scmp.lt.u32.totalorder %s2512_s22, %s3150_s10 }
 0x272   : > { %p2514_p7 = pnand %p2513_p4, %p2645_p5 }
 0x273   : > { %p2519_p11 = por %p2518_p10, %p2517_p9 }
 0x274   : > { %p2515_p8 = pneg %p2514_p7 }
 0x275   : > { %p2521_p13 = por %p2520_p12, %p2519_p11 }
 0x277   : > { %p2522_p0 = pnand %p2521_p13, %p2515_p8 }
 0x279   : > { %2525 = shalt.err (!%p2522_p0)
}
 0x27a   : > { %2416 = dma.vmem_to_hbm [thread:$0]  (%p2645_p5), %s3152_s15, 64, %s3150_s10, %s2014_s18  }
 0x27b PF: > { %p2422_p1 = scmp.ge.s32.totalorder %s2560_s29, 2  ;;  %s2040_s14 = sand.u32 1, %s2548_s26  }
 0x27c   : > { %s2041_s16 = scalar_lea.sflag [#allocation4], %s2040_s14 }
 0x27d   : > { %p2419_p2 = pnand %p2422_p1, %p2649_p6 }
 0x27f   : > { %2543 = dma.done.wait (!%p2419_p2), %s2041_s16, 64  }
 0x280   : > { %2545 = vsyncadd (!%p2419_p2), %s2041_s16, 4294967232  ;;  %p18_p3 = scmp.ge.s32.totalorder %s2632_s8, 4   ;;  %s3209_s26 = smov %s2552_s27 }
 0x281   : > { %s3210_s27 = smov %s2556_s28  ;;  %s3211_s28 = smov %s2643_s11 }
 0x282   : > { %s3212_s29 = smov %s2632_s8  ;;  %20 = sbr.rel (!%p18_p3) target bundleno = 5 (0x5), region = 83 }
 0x289   :  { %2046 = vsyncpa [#allocation4], 1 }
 0x28a   :  { %2048 = vsyncpa [#allocation4 + $0x1], 1 }

</bundles_post_ra>
